<compile_context>
chip_gen: v7x
topology: tpu7x:2x2x1
jax: 0.10.0
libtpu: 0.0.40
codegen_flags: <defaults>
</compile_context>

<pallas_src>
import functools

import jax
import jax.numpy as jnp
from jax.experimental import pallas as pl
from jax.experimental.pallas import tpu as pltpu


def _round_up(x: int, m: int) -> int:
    return (x + m - 1) // m * m


def _pick_energy_dtype():
    """bf16 tanh on chips with a bf16 EUP (v6e / v7x); f32 otherwise."""
    try:
        kind = jax.devices()[0].device_kind.lower()
    except Exception:
        return jnp.float32
    if any(tag in kind for tag in ("v6", "v7", "7x")):
        return jnp.bfloat16
    return jnp.float32


def _additive_attn_kernel(q_ref, k_ref, wq_ref, wk_ref, v_ref, vb_ref,
                          out_ref, kp_ref, *, s_valid, s_chunk, energy_dtype):
    # q_ref:  [1, tT, H]      k_ref: [1, S_pad, H]
    # wq/wk:  [H, H]          v_ref: [1, H]        vb_ref: [1, 1] (SMEM)
    # out_ref:[1, tT, S_pad]  kp_ref (VMEM scratch): [S_pad, H] energy_dtype
    t_tile = q_ref.shape[1]
    hidden = q_ref.shape[2]
    s_pad = kp_ref.shape[0]
    n_chunks = s_pad // s_chunk

    # Key projection once per batch (first T tile); cached across T tiles.
    @pl.when(pl.program_id(1) == 0)
    def _():
        kp = jnp.dot(k_ref[0], wk_ref[...], preferred_element_type=jnp.float32)
        kp_ref[...] = kp.astype(kp_ref.dtype)

    # Per-tile query projection (MXU), cast down for the EUP-bound tanh block.
    qp = jnp.dot(q_ref[0], wq_ref[...], preferred_element_type=jnp.float32)
    qp = qp.astype(energy_dtype)[:, None, :]                 # [tT, 1, H]

    v_row = v_ref[...].reshape(1, 1, hidden)                 # f32, lane-resident
    vb = vb_ref[0, 0]                                        # scalar from SMEM

    def s_body(si, carry):
        s0 = pl.multiple_of(si * s_chunk, s_chunk)
        kp_c = kp_ref[pl.ds(s0, s_chunk), :]                 # [tS, H]
        e = jnp.tanh(qp + kp_c[None, :, :])                  # [tT, tS, H]
        # VPU multiply + XLU lane reduce (instead of an N=1 MXU matmul).
        energies = jnp.sum(e * v_row, axis=-1) + vb          # [tT, tS] f32
        out_ref[0, :, pl.ds(s0, s_chunk)] = energies         # stage in out block
        return carry

    jax.lax.fori_loop(0, n_chunks, s_body, 0, unroll=n_chunks <= 8)

    # Softmax over the (padded) src axis; energies staged in the output block.
    energies = out_ref[0]                                    # [tT, S_pad] f32
    if s_valid != s_pad:
        col = jax.lax.broadcasted_iota(jnp.int32, (t_tile, s_pad), 1)
        energies = jnp.where(col < s_valid, energies, jnp.float32(-1e30))
    m = jnp.max(energies, axis=-1, keepdims=True)
    ex = jnp.exp(energies - m)
    denom = jnp.sum(ex, axis=-1, keepdims=True)
    out_ref[0] = (ex * pl.reciprocal(denom, approx=True)).astype(out_ref.dtype)


@functools.partial(jax.jit, static_argnames=("energy_dtype", "t_tile"))
def additive_attention(query, key, wq, wk, v, vb, *, energy_dtype=None, t_tile=None):
    """query: [B, T, H], key: [B, S, H] -> attention weights [B, T, S] (f32)."""
    B, T, H = query.shape
    _, S, Hk = key.shape
    assert Hk == H, "hidden size mismatch"

    if energy_dtype is None:
        energy_dtype = _pick_energy_dtype()

    v = jnp.asarray(v).reshape(1, H).astype(jnp.float32)
    vb = jnp.asarray(vb).reshape(1, 1).astype(jnp.float32)

    # T tile: multiple of 8 (sublanes), capped at 128.  S padded to 128 lanes
    # for a lane-dense output and aligned in-kernel chunks.
    if t_tile is None:
        t_tile = min(128, _round_up(T, 8))
    T_pad = _round_up(T, t_tile)
    S_pad = _round_up(S, 128)
    s_chunk = min(128, S_pad)

    if T_pad != T:
        query = jnp.pad(query, ((0, 0), (0, T_pad - T), (0, 0)))
    if S_pad != S:
        key = jnp.pad(key, ((0, 0), (0, S_pad - S), (0, 0)))

    n_t = T_pad // t_tile

    kernel = functools.partial(
        _additive_attn_kernel,
        s_valid=S, s_chunk=s_chunk, energy_dtype=energy_dtype)

    cost = pl.CostEstimate(
        flops=2 * B * (T_pad + S_pad) * H * H          # projections
              + 3 * B * T_pad * S_pad * H              # add + mul + reduce
              + 5 * B * T_pad * S_pad,                 # softmax arithmetic
        transcendentals=B * T_pad * S_pad * H + B * T_pad * S_pad,
        bytes_accessed=4 * (query.size + key.size + wq.size + wk.size
                            + v.size + B * T_pad * S_pad),
    )

    out = pl.pallas_call(
        kernel,
        out_shape=jax.ShapeDtypeStruct((B, T_pad, S_pad), jnp.float32),
        grid_spec=pltpu.PrefetchScalarGridSpec(
            num_scalar_prefetch=0,
            grid=(B, n_t),
            in_specs=[
                pl.BlockSpec((1, t_tile, H), lambda b, t: (b, t, 0)),   # query tile
                pl.BlockSpec((1, S_pad, H), lambda b, t: (b, 0, 0)),    # key (DMA'd only when b changes)
                pl.BlockSpec((H, H), lambda b, t: (0, 0)),              # Wq
                pl.BlockSpec((H, H), lambda b, t: (0, 0)),              # Wk
                pl.BlockSpec((1, H), lambda b, t: (0, 0)),              # v row (lane-resident)
                pl.BlockSpec(memory_space=pltpu.MemorySpace.SMEM),      # vT bias scalar
            ],
            out_specs=pl.BlockSpec((1, t_tile, S_pad), lambda b, t: (b, t, 0)),
            scratch_shapes=[pltpu.VMEM((S_pad, H), energy_dtype)],      # cached key projection
        ),
        compiler_params=pltpu.CompilerParams(
            dimension_semantics=("parallel", "arbitrary"),
        ),
        cost_estimate=cost,
    )(query, key, wq, wk, v, vb)

    return out[:, :T, :S]


def _reference(query, key, wq, wk, v, vb):
    qp = query @ wq                                        # [B, T, H]
    kp = key @ wk                                          # [B, S, H]
    e = jnp.tanh(qp[:, :, None, :] + kp[:, None, :, :])    # [B, T, S, H]
    energies = jnp.einsum("btsh,h->bts", e, v.reshape(-1)) + vb.reshape(())
    return jax.nn.softmax(energies, axis=-1)


if __name__ == "__main__":
    B, T, S, H = 2, 8, 8, 32

    key0 = jax.random.PRNGKey(0)
    k_q, k_k, k_wq, k_wk, k_v, k_vb = jax.random.split(key0, 6)

    query = jax.random.normal(k_q, (B, T, H), dtype=jnp.float32)
    key_t = jax.random.normal(k_k, (B, S, H), dtype=jnp.float32)

    # nn.Linear-like init.  Wq/Wk stored as [H_in, H_out]; v is vT.weight [1,H].
    scale = 1.0 / jnp.sqrt(H)
    wq = jax.random.uniform(k_wq, (H, H), jnp.float32, -scale, scale)   # query_layer (bias=False)
    wk = jax.random.uniform(k_wk, (H, H), jnp.float32, -scale, scale)   # key_layer   (bias=False)
    v = jax.random.uniform(k_v, (1, H), jnp.float32, -scale, scale)     # vT.weight
    vb = jax.random.uniform(k_vb, (1, 1), jnp.float32, -scale, scale)   # vT.bias

    energy_dtype = _pick_energy_dtype()
    out = additive_attention(query, key_t, wq, wk, v, vb, energy_dtype=energy_dtype)
    out = jax.block_until_ready(out)

    ref = _reference(query, key_t, wq, wk, v, vb)
    # f32 path: tolerance covers the approx EUP reciprocal; bf16 path: covers
    # bf16 tanh on the EUP vs the f32 XLA reference.
    tol = 5e-2 if energy_dtype == jnp.bfloat16 else 3e-3
    assert out.shape == (B, T, S)
    assert jnp.allclose(out, ref, atol=tol, rtol=tol), "mismatch vs reference"

    print("KERNEL_OK")
</pallas_src>

<mosaic_0001>
module attributes {stable_mosaic.version = 11 : i64} {
  func.func @_additive_attn_kernel(%arg0: i32, %arg1: i32, %arg2: memref<1x8x32xf32, #tpu.memory_space<vmem>>, %arg3: memref<1x128x32xf32, #tpu.memory_space<vmem>>, %arg4: memref<32x32xf32, #tpu.memory_space<vmem>>, %arg5: memref<32x32xf32, #tpu.memory_space<vmem>>, %arg6: memref<1x32xf32, #tpu.memory_space<vmem>>, %arg7: memref<1x1xf32, #tpu.memory_space<smem>>, %arg8: memref<1x8x128xf32, #tpu.memory_space<vmem>>, %arg9: memref<128x32xf32, #tpu.memory_space<vmem>>) attributes {dimension_semantics = [#tpu.dimension_semantics<parallel>, #tpu.dimension_semantics<arbitrary>], iteration_bounds = array<i64: 2, 1>, scalar_prefetch = 0 : i64, scratch_operands = 1 : i64, tpu.core_type = #tpu.core_type<tc>, window_params = [{transform_indices = @transform_0, window_bounds = array<i64: 1, 8, 32>}, {transform_indices = @transform_1, window_bounds = array<i64: 1, 128, 32>}, {pipeline_mode = #tpu.pipeline_mode<synchronous>, transform_indices = @transform_2, window_bounds = array<i64: 32, 32>}, {pipeline_mode = #tpu.pipeline_mode<synchronous>, transform_indices = @transform_3, window_bounds = array<i64: 32, 32>}, {pipeline_mode = #tpu.pipeline_mode<synchronous>, transform_indices = @transform_4, window_bounds = array<i64: 1, 32>}, {transform_indices = @transform_5, window_bounds = array<i64: 1, 1>}, {transform_indices = @transform_6, window_bounds = array<i64: 1, 8, 128>}]} {
    %c0_i32 = arith.constant 0 : i32
    %0 = arith.cmpi eq, %arg1, %c0_i32 : i32
    %1 = arith.extui %0 : i1 to i32
    %c0_i32_0 = arith.constant 0 : i32
    %2 = arith.cmpi ne, %1, %c0_i32_0 : i32
    scf.if %2 {
      %c0_23 = arith.constant 0 : index
      %c0_24 = arith.constant 0 : index
      %c0_25 = arith.constant 0 : index
      %49 = vector.load %arg3[%c0_23, %c0_24, %c0_25] : memref<1x128x32xf32, #tpu.memory_space<vmem>>, vector<1x128x32xf32>
      %50 = vector.shape_cast %49 : vector<1x128x32xf32> to vector<128x32xf32>
      %c0_26 = arith.constant 0 : index
      %c0_27 = arith.constant 0 : index
      %51 = vector.load %arg5[%c0_26, %c0_27] : memref<32x32xf32, #tpu.memory_space<vmem>>, vector<32x32xf32>
      %cst_28 = arith.constant dense<0.000000e+00> : vector<128x32xf32>
      %52 = tpu.matmul %50, %51, %cst_28 {dimension_numbers = #tpu.dot_dimension_numbers<[1], [0], [0], [1], [0, 0, 1, 1], [], []>} : vector<128x32xf32>, vector<32x32xf32>, vector<128x32xf32> -> vector<128x32xf32>
      %c0_29 = arith.constant 0 : index
      %c0_30 = arith.constant 0 : index
      %53 = vector.load %arg9[%c0_29, %c0_30] : memref<128x32xf32, #tpu.memory_space<vmem>>, vector<128x32xf32>
      tpu.vector_store %arg9[%c0_29, %c0_30], %52 {strides = array<i32>} : memref<128x32xf32, #tpu.memory_space<vmem>>, vector<128x32xf32>,
    } else {
    }
    %c0 = arith.constant 0 : index
    %c0_1 = arith.constant 0 : index
    %c0_2 = arith.constant 0 : index
    %3 = vector.load %arg2[%c0, %c0_1, %c0_2] : memref<1x8x32xf32, #tpu.memory_space<vmem>>, vector<1x8x32xf32>
    %4 = vector.shape_cast %3 : vector<1x8x32xf32> to vector<8x32xf32>
    %c0_3 = arith.constant 0 : index
    %c0_4 = arith.constant 0 : index
    %5 = vector.load %arg4[%c0_3, %c0_4] : memref<32x32xf32, #tpu.memory_space<vmem>>, vector<32x32xf32>
    %cst = arith.constant dense<0.000000e+00> : vector<8x32xf32>
    %6 = tpu.matmul %4, %5, %cst {dimension_numbers = #tpu.dot_dimension_numbers<[1], [0], [0], [1], [0, 0, 1, 1], [], []>} : vector<8x32xf32>, vector<32x32xf32>, vector<8x32xf32> -> vector<8x32xf32>
    %7 = vector.shape_cast %6 : vector<8x32xf32> to vector<8x1x32xf32>
    %c0_5 = arith.constant 0 : index
    %c0_6 = arith.constant 0 : index
    %8 = vector.load %arg6[%c0_5, %c0_6] : memref<1x32xf32, #tpu.memory_space<vmem>>, vector<1x32xf32>
    %9 = vector.shape_cast %8 : vector<1x32xf32> to vector<1x1x32xf32>
    %c0_7 = arith.constant 0 : index
    %c0_8 = arith.constant 0 : index
    %10 = memref.load %arg7[%c0_7, %c0_8] : memref<1x1xf32, #tpu.memory_space<smem>>
    %c0_i32_9 = arith.constant 0 : i32
    %c128_i32 = arith.constant 128 : i32
    %11 = arith.muli %c0_i32_9, %c128_i32 : i32
    %12 = tpu.assume_multiple %11, 128 : i32
    %13 = arith.index_cast %12 : i32 to index
    %c0_10 = arith.constant 0 : index
    %14 = vector.load %arg9[%13, %c0_10] : memref<128x32xf32, #tpu.memory_space<vmem>>, vector<128x32xf32>
    %15 = vector.shape_cast %14 : vector<128x32xf32> to vector<1x128x32xf32>
    %16 = vector.broadcast %7 : vector<8x1x32xf32> to vector<8x128x32xf32>
    %17 = vector.broadcast %15 : vector<1x128x32xf32> to vector<8x128x32xf32>
    %18 = arith.addf %16, %17 : vector<8x128x32xf32>
    %19 = math.tanh %18 : vector<8x128x32xf32>
    %20 = vector.broadcast %9 : vector<1x1x32xf32> to vector<8x128x32xf32>
    %21 = arith.mulf %19, %20 : vector<8x128x32xf32>
    %cst_11 = arith.constant dense<0.000000e+00> : vector<8x128xf32>
    %22 = vector.multi_reduction <add>, %21, %cst_11 [2] : vector<8x128x32xf32> to vector<8x128xf32>
    %23 = vector.broadcast %10 : f32 to vector<8x128xf32>
    %24 = arith.addf %22, %23 : vector<8x128xf32>
    %c0_12 = arith.constant 0 : index
    %c0_13 = arith.constant 0 : index
    %25 = arith.index_cast %12 : i32 to index
    %26 = vector.load %arg8[%c0_12, %c0_13, %25] : memref<1x8x128xf32, #tpu.memory_space<vmem>>, vector<1x8x128xf32>
    %27 = vector.shape_cast %26 : vector<1x8x128xf32> to vector<8x128xf32>
    %28 = vector.shape_cast %24 : vector<8x128xf32> to vector<1x8x128xf32>
    tpu.vector_store %arg8[%c0_12, %c0_13, %25], %28 {strides = array<i32>} : memref<1x8x128xf32, #tpu.memory_space<vmem>>, vector<1x8x128xf32>,
    %c1_i32 = arith.constant 1 : i32
    %c0_14 = arith.constant 0 : index
    %c0_15 = arith.constant 0 : index
    %c0_16 = arith.constant 0 : index
    %29 = vector.load %arg8[%c0_14, %c0_15, %c0_16] : memref<1x8x128xf32, #tpu.memory_space<vmem>>, vector<1x8x128xf32>
    %30 = vector.shape_cast %29 : vector<1x8x128xf32> to vector<8x128xf32>
    %31 = tpu.iota {dimensions = array<i32: 1>} : vector<8x128xi32>
    %c8_i32 = arith.constant 8 : i32
    %32 = vector.broadcast %c8_i32 : i32 to vector<8x128xi32>
    %33 = arith.cmpi slt, %31, %32 : vector<8x128xi32>
    %cst_17 = arith.constant -1.000000e+30 : f32
    %34 = vector.broadcast %cst_17 : f32 to vector<8x128xf32>
    %35 = arith.select %33, %30, %34 : vector<8x128xi1>, vector<8x128xf32>
    %cst_18 = arith.constant dense<0xFF800000> : vector<8xf32>
    %36 = vector.multi_reduction <maximumf>, %35, %cst_18 [1] : vector<8x128xf32> to vector<8xf32>
    %37 = vector.shape_cast %36 : vector<8xf32> to vector<8x1xf32>
    %38 = vector.broadcast %37 : vector<8x1xf32> to vector<8x128xf32>
    %39 = arith.subf %35, %38 : vector<8x128xf32>
    %40 = math.exp %39 : vector<8x128xf32>
    %cst_19 = arith.constant dense<0.000000e+00> : vector<8xf32>
    %41 = vector.multi_reduction <add>, %40, %cst_19 [1] : vector<8x128xf32> to vector<8xf32>
    %42 = vector.shape_cast %41 : vector<8xf32> to vector<8x1xf32>
    %43 = tpu.reciprocal %42 {approx = true} : vector<8x1xf32> -> vector<8x1xf32>
    %44 = vector.broadcast %43 : vector<8x1xf32> to vector<8x128xf32>
    %45 = arith.mulf %40, %44 : vector<8x128xf32>
    %c0_20 = arith.constant 0 : index
    %c0_21 = arith.constant 0 : index
    %c0_22 = arith.constant 0 : index
    %46 = vector.load %arg8[%c0_20, %c0_21, %c0_22] : memref<1x8x128xf32, #tpu.memory_space<vmem>>, vector<1x8x128xf32>
    %47 = vector.shape_cast %46 : vector<1x8x128xf32> to vector<8x128xf32>
    %48 = vector.shape_cast %45 : vector<8x128xf32> to vector<1x8x128xf32>
    tpu.vector_store %arg8[%c0_20, %c0_21, %c0_22], %48 {strides = array<i32>} : memref<1x8x128xf32, #tpu.memory_space<vmem>>, vector<1x8x128xf32>,
    return
  }
  func.func @transform_0(%arg0: i32, %arg1: i32) -> (i32, i32, i32) {
    %c0_i32 = arith.constant 0 : i32
    %c0_i32_0 = arith.constant 0 : i32
    return %arg0, %arg1, %c0_i32 : i32, i32, i32
  }
  func.func @transform_1(%arg0: i32, %arg1: i32) -> (i32, i32, i32) {
    %c0_i32 = arith.constant 0 : i32
    %c0_i32_0 = arith.constant 0 : i32
    %c0_i32_1 = arith.constant 0 : i32
    return %arg0, %c0_i32, %c0_i32_0 : i32, i32, i32
  }
  func.func @transform_2(%arg0: i32, %arg1: i32) -> (i32, i32) {
    %c0_i32 = arith.constant 0 : i32
    %c0_i32_0 = arith.constant 0 : i32
    %c0_i32_1 = arith.constant 0 : i32
    return %c0_i32, %c0_i32_0 : i32, i32
  }
  func.func @transform_3(%arg0: i32, %arg1: i32) -> (i32, i32) {
    %c0_i32 = arith.constant 0 : i32
    %c0_i32_0 = arith.constant 0 : i32
    %c0_i32_1 = arith.constant 0 : i32
    return %c0_i32, %c0_i32_0 : i32, i32
  }
  func.func @transform_4(%arg0: i32, %arg1: i32) -> (i32, i32) {
    %c0_i32 = arith.constant 0 : i32
    %c0_i32_0 = arith.constant 0 : i32
    %c0_i32_1 = arith.constant 0 : i32
    return %c0_i32, %c0_i32_0 : i32, i32
  }
  func.func @transform_5(%arg0: i32, %arg1: i32) -> (i32, i32) {
    %c0_i32 = arith.constant 0 : i32
    %c0_i32_0 = arith.constant 0 : i32
    %c0_i32_1 = arith.constant 0 : i32
    return %c0_i32, %c0_i32_0 : i32, i32
  }
  func.func @transform_6(%arg0: i32, %arg1: i32) -> (i32, i32, i32) {
    %c0_i32 = arith.constant 0 : i32
    %c0_i32_0 = arith.constant 0 : i32
    return %arg0, %arg1, %c0_i32 : i32, i32, i32
  }
}

</mosaic_0001>

<bundles_post_ra>
// kernel: additive_attention.1
= control target key start
LH: loop header
LB: loop body
LE: loop exit
PB: predicated region body
PF: predicated region fallthrough
CT: control target
= control target key end

     0   :  { %s4872_s0 = inlined_call_operand.vmem [shape: f32[2,8,32], index: 0, kind: input, shape index: {}]   ;;  %s4873_s1 = inlined_call_operand.vmem [shape: f32[2,128,32], index: 1, kind: input, shape index: {}]   ;;  %s4874_s2 = inlined_call_operand.vmem [shape: f32[32,32], index: 2, kind: input, shape index: {}]   ;;  %s4875_s3 = inlined_call_operand.vmem [shape: f32[32,32], index: 3, kind: input, shape index: {}]   ;;  %s4876_s4 = inlined_call_operand.vmem [shape: f32[1,32], index: 4, kind: input, shape index: {}]   ;;  %s4877_s5 = inlined_call_operand.<no memory space> [shape: f32[1,1], index: 5, kind: input, shape index: {}]   ;;  %s4878_s6 = inlined_call_operand.hbm [shape: f32[2,8,128], index: 6, kind: output, shape index: {}]  }
   0x1   :  { %11 = sst [smem:[#allocation3]] %s4877_s5 }
   0x2   :  { %12 = vsyncpa [#allocation5], 0 }
   0x3   :  { %14 = vsyncpa [#allocation5 + $0x1], 0  ;;  %s3110_s23 = smov 0   ;;  %s3112_s24 = smov 0  }
   0x4   :  { %s3114_s25 = smov 0   ;;  %s3116_s26 = smov 0  }
   0x5   :  { %s3118_s27 = smov 0   ;;  %s3120_s28 = smov 0  }
   0x6 LB: > { %s2536_s5 = sadd.s32 4294967295, %s3065_s28   ;;  %s2537_s29 = sadd.s32 4294967294, %s3065_s28   ;;  %s3065_s28 = sphi %s3120_s28, %s20_s28   ;;  %s3061_s27 = sphi %s3118_s27, %s5004_s27   ;;  %s3057_s26 = sphi %s3116_s26, %s5003_s26   ;;  %s3053_s25 = sphi %s3114_s25, %s5002_s25   ;;  %s3049_s24 = sphi %s3112_s24, %s5001_s24   ;;  %s3045_s23 = sphi %s3110_s23, %s5000_s23  }
   0x7   : > { %s32_s30 = sadd.s32 1, %s3061_s27  ;;  %s179_s7 = sadd.s32 1, %s3053_s25 }
   0x8   : > { %p34_p0 = scmp.ge.s32.totalorder %s32_s30, 2  ;;  %p189_p1 = scmp.ne.s32.totalorder %s3053_s25, %s3049_s24 }
   0x9   : > { %p190_p2 = scmp.eq.s32.totalorder %s2536_s5, 1  ;;  %p195_p3 = scmp.ne.s32.totalorder %s3049_s24, %s3045_s23 }
   0xa   : > { %s5006_s30 = smov (%p34_p0, %s32_s30), 0  ;;  %p196_p5 = scmp.eq.s32.totalorder %s2537_s29, 1 }
   0xb   : > { %p3150_p4 = por %p190_p2, %p189_p1  ;;  %s174_s9 = ssub.s32 %s3061_s27, %s5006_s30 }
   0xc   : > { %p2540_p6 = scmp.ge.s32.totalorder %s3065_s28, 1  ;;  %p177_p7 = scmp.eq.s32.totalorder %s174_s9, 0 }
   0xd   : > { %p3157_p8 = por %p196_p5, %p195_p3  ;;  %p244_p9 = scmp.lt.s32.totalorder %s3065_s28, 3 }
   0xe   : > { %s3163_s11 = scalar_select %p177_p7, %s3053_s25, %s179_s7  }
   0xf   : > { %p245_p10 = pnand %p2540_p6, %p244_p9 }
  0x11   : > { %248 = sbr.rel (%p245_p10) target bundleno = 1024 (0x400), region = 44 }
  0x18   : > { %v313_v0 = vld [vmem:[%s4875_s3] sm:$0xff]  ;;  %v314_v1 = vld [vmem:[%s4875_s3 + $0x8] sm:$0xff]  ;;  %v315_v2 = vld [vmem:[%s4875_s3 + $0x10] sm:$0xff]  ;;  %p281_p11 = scmp.lt.s32.totalorder %s3057_s26, 1  ;;  %vm317_vm0 = vcmask 261120   ;;  %v3067_v13 = vmov 0.0|0.0   ;;  %v611_v37 = vlaneseq }
  0x19   : > { %v2636_v3 = vpack.c.bf16 %v314_v1, %v313_v0  ;;  %v316_v4 = vld [vmem:[%s4875_s3 + $0x18] sm:$0xff]  ;;  %v528_v6 = vld [vmem:[%s4874_s2] sm:$0xff]  ;;  %v529_v7 = vld [vmem:[%s4874_s2 + $0x8] sm:$0xff]  ;;  %vm3068_vm1 = vmmov 0   ;;  %v3069_v26 = vmov 0.0   ;;  %vm1756_vm2 = vcmask 130112  }
  0x1a   : > { %v2640_v5 = vpack.c.bf16 %v316_v4, %v315_v2  ;;  %s3179_s20 = scalar_select %p281_p11, %s3057_s26, 1  ;;  %v2645_v12 = vpack.c.bf16 %v529_v7, %v528_v6  ;;  %v530_v16 = vld [vmem:[%s4874_s2 + $0x10] sm:$0xff]  ;;  %v531_v17 = vld [vmem:[%s4874_s2 + $0x18] sm:$0xff]  ;;  %v3070_v35 = vmov 1966171168   ;;  %v3243_v43 = vshrl.u32 %v611_v37, 7 }
  0x1b   : > { %2637 = vmatprep.subr.bf16.mxu0 %v2636_v3  ;;  %2650 = vmatprep.subr.bf16.mxu1 %v2636_v3  ;;  %v2648_v22 = vpack.c.bf16 %v531_v17, %v530_v16  ;;  %v609_v36 = vunpack.c.l.s4 %v3070_v35  ;;  %vm1763_vm3 = vcmask 195712   ;;  %vm1770_vm4 = vcmask 261312   ;;  %s278_s12 = sand.u32 1, %s3049_s24   ;;  %s2564_s14 = sshll.u32 %s3057_s26, 7 }
  0x1c   : > { %2639 = vmatpush3.bf16.msra.mxu0 %v2636_v3  ;;  %2652 = vmatpush3.bf16.msra.mxu1 %v2636_v3  ;;  %s2567_s21 = sshll.u32 %s3179_s20, 7  ;;  %s2542_s18 = sshll.u32 %s3179_s20, 3  ;;  %v3254_v55 = vsub.s32 0, %v3243_v43  ;;  %vm1777_vm5 = vcmask 326912   ;;  %vm1784_vm6 = vcmask 392512   ;;  %vm1791_vm7 = vcmask 458112  }
  0x1d   : > { %2641 = vmatprep.subr.bf16.mxu0 %v2640_v5  ;;  %2651 = vmatprep.subr.bf16.mxu1 %v2640_v5  ;;  %s3185_s29 = scalar_lea.vmem %s4873_s1, %s2567_s21  ;;  %s287_s22 = scalar_lea.vmem %s4872_s0, %s2542_s18  ;;  %v610_v42 = vunpack.c.0.s8 %v609_v36  ;;  %vm1798_vm8 = vcmask 523712   ;;  %vm1805_vm9 = vcmask 589312   ;;  %vm1812_vm10 = vcmask 654912  }
  0x1e   : > { %v297_v8 = vld [vmem:[%s3185_s29] sm:$0xff]  ;;  %v307_v9 = vld [vmem:[%s3185_s29 + $0x50] sm:$0xff]  ;;  %v298_v10 = vld [vmem:[%s3185_s29 + $0x8] sm:$0xff]  ;;  %vm1819_vm11 = vcmask 720512   ;;  %vm1826_vm12 = vcmask 786112   ;;  %vm1833_vm13 = vcmask 851712   ;;  %s4825_s19 = scalar_lea.hbm %s4878_s6, %s2564_s14 }
  0x1f   : > { %2601 = vmatprep.mubr.msk.f32.mxu0 %vm317_vm0, %v297_v8  ;;  %2616 = vmatprep.mubr.msk.f32.mxu1 %vm317_vm0, %v307_v9  ;;  %v308_v11 = vld [vmem:[%s3185_s29 + $0x58] sm:$0xff]  ;;  %v299_v14 = vld [vmem:[%s3185_s29 + $0x10] sm:$0xff]  ;;  %v309_v15 = vld [vmem:[%s3185_s29 + $0x60] sm:$0xff]  ;;  %v613_v48 = vsub.s32 %v610_v42, %v3243_v43  ;;  %vm1840_vm14 = vcmask 917312   ;;  %vm1847_vm15 = vcmask 982912   ;;  %s2541_s13 = sshll.u32 %s278_s12, 3 }
  0x20   : > { %2643 = vmatpush3.bf16.msra.mxu0 %v2640_v5  ;;  %2653 = vmatpush3.bf16.msra.mxu1 %v2640_v5  ;;  %v300_v18 = vld [vmem:[%s3185_s29 + $0x18] sm:$0xff]  ;;  %v310_v19 = vld [vmem:[%s3185_s29 + $0x68] sm:$0xff]  ;;  %v301_v20 = vld [vmem:[%s3185_s29 + $0x20] sm:$0xff]  ;;  %s280_s15 = scalar_lea.vmem [#allocation4], %s2541_s13  ;;  %s2439_s21 = scalar_lea.sflag [#allocation5], %s278_s12 }
  0x21   : > { %2644 = vmatprep.subr.bf16.mxu1 %v3067_v13  ;;  %v311_v21 = vld [vmem:[%s3185_s29 + $0x70] sm:$0xff]  ;;  %v302_v23 = vld [vmem:[%s3185_s29 + $0x28] sm:$0xff]  ;;  %v312_v24 = vld [vmem:[%s3185_s29 + $0x78] sm:$0xff]  ;;  %s2453_s16 = sshll.u32 %s280_s15, 4  ;;  %s3071_s26 = smov [#allocation4]   ;;  %s4827_s16 = int_to_ptr.vmem [resolvable:$true] %s2453_s16 }
  0x22   : > { %v303_v25 = vld [vmem:[%s3185_s29 + $0x30] sm:$0xff]  ;;  %v304_v27 = vld [vmem:[%s3185_s29 + $0x38] sm:$0xff]  ;;  %v527_v28 = vld [vmem:[%s287_s22] sm:$0xff]  ;;  %s2987_s22 = scalar_lea.vmem %s4827_s16, 128  ;;  %s2991_s20 = sshll.u32 %s3071_s26, 4  ;;  %s2992_s20 = int_to_ptr.vmem [resolvable:$false] %s2991_s20 }
  0x23   : > { %2602 = vmatmul.mubr.msk.f32.vlgmr.msra.gmra.mrb[0].mxu0 %vm317_vm0, %v298_v10  ;;  %2617 = vmatmul.mubr.msk.f32.vlgmr.msra.gmra.mrb[0].mxu1 %vm317_vm0, %v308_v11  ;;  %v305_v29 = vld [vmem:[%s3185_s29 + $0x40] sm:$0xff]  ;;  %v306_v30 = vld [vmem:[%s3185_s29 + $0x48] sm:$0xff]  ;;  %s657_s29 = sld [smem:[#allocation3]]  ;;  %p2988_p12 = scmp.ne.s32.totalorder %s4827_s16, %s2987_s22 }
  0x24   : > { %2646 = vmatpush3.bf16.msra.mxu1 %v2645_v12  ;;  %2604 = vmatprep.mubr.msk.f32.mxu0 %vm317_vm0, %v299_v14  ;;  %s2993_s5 = scalar_lea.vmem %s2992_s20, 256  ;;  %p2994_p1 = scmp.lt.s32.totalorder %s4827_s16, %s2992_s20 }
  0x25   : > { %2619 = vmatprep.mubr.msk.f32.mxu1 %vm317_vm0, %v309_v15  ;;  %2647 = vmatprep.subr.bf16.mxu1 %v3067_v13  ;;  %p2989_p13 = pnand %p2988_p12, %p3150_p4  ;;  %p2995_p2 = scmp.lt.s32.totalorder %s2993_s5, %s2987_s22 }
  0x27   : > { %2605 = vmatmul.mubr.msk.f32.gmra.mrb[2].mxu0 %vm317_vm0, %v300_v18  ;;  %2620 = vmatmul.mubr.msk.f32.gmra.mrb[2].mxu1 %vm317_vm0, %v310_v19  ;;  %p2990_p0 = pneg %p2989_p13  ;;  %p2996_p3 = por %p2995_p2, %p2994_p1 }
  0x28   : > { %2607 = vmatprep.mubr.msk.f32.mxu0 %vm317_vm0, %v301_v20  ;;  %2622 = vmatprep.mubr.msk.f32.mxu1 %vm317_vm0, %v311_v21 }
  0x29   : > { %2649 = vmatpush3.bf16.msra.mxu1 %v2648_v22  ;;  %p2997_p5 = pnand %p2996_p3, %p2990_p0 }
  0x2b   : > { %2608 = vmatmul.mubr.msk.f32.gmra.mrb[4].mxu0 %vm317_vm0, %v302_v23  ;;  %2623 = vmatmul.mubr.msk.f32.gmra.mrb[4].mxu1 %vm317_vm0, %v312_v24 }
  0x2c   : > { %2610 = vmatprep.mubr.msk.f32.mxu0 %vm317_vm0, %v303_v25  ;;  %2633 = vmatprep.mubr.msk.f32.mxu1 %vm3068_vm1, %v3069_v26  ;;  %vm2409_vm1 = vcmask 1041409  }
  0x2f   : > { %2611 = vmatmul.mubr.msk.f32.gmra.mrb[6].mxu0 %vm317_vm0, %v304_v27  ;;  %2634 = vmatmul.mubr.msk.f32.vlgmr.msra.gmra.mrb[6].mxu1 %vm317_vm0, %v527_v28  ;;  %v3318_v28 = vld [vmem:[%s4876_s4] ss:$0 sm:$0xff] }
  0x30   : > { %2613 = vmatprep.mubr.msk.f32.mxu0 %vm317_vm0, %v305_v29 }
  0x33   : > { %2614 = vmatmul.mubr.msk.f32.gmra.mrb[8].mxu0 %vm317_vm0, %v306_v30 }
  0xf6   : > { %v2618_v31 = vpop.f32.mrb[0].mxu1  ;;  %v2603_v32 = vpop.f32.mrb[0].mxu0 }
  0xf7   : > { %522 = vst.msk [vmem:[#allocation2 + $0x58] sm:$0xff] %vm317_vm0, %v2618_v31  ;;  %v482_v33 = vpop.f32.mrb[1].mxu1  ;;  %512 = vst.msk [vmem:[#allocation2 + $0x8] sm:$0xff] %vm317_vm0, %v2603_v32  ;;  %v432_v34 = vpop.f32.mrb[1].mxu0 }
  0xf8   : > { %521 = vst.msk [vmem:[#allocation2 + $0x50] sm:$0xff] %vm317_vm0, %v482_v33  ;;  %511 = vst.msk [vmem:[#allocation2] sm:$0xff] %vm317_vm0, %v432_v34 }
  0xfa   : > { %v2621_v38 = vpop.f32.mrb[2].mxu1  ;;  %v2606_v39 = vpop.f32.mrb[2].mxu0 }
  0xfb   : > { %524 = vst.msk [vmem:[#allocation2 + $0x68] sm:$0xff] %vm317_vm0, %v2621_v38  ;;  %v492_v40 = vpop.f32.mrb[3].mxu1  ;;  %514 = vst.msk [vmem:[#allocation2 + $0x18] sm:$0xff] %vm317_vm0, %v2606_v39  ;;  %v442_v41 = vpop.f32.mrb[3].mxu0 }
  0xfc   : > { %523 = vst.msk [vmem:[#allocation2 + $0x60] sm:$0xff] %vm317_vm0, %v492_v40  ;;  %513 = vst.msk [vmem:[#allocation2 + $0x10] sm:$0xff] %vm317_vm0, %v442_v41 }
  0xfe   : > { %v2624_v44 = vpop.f32.mrb[4].mxu1  ;;  %v2609_v45 = vpop.f32.mrb[4].mxu0  ;;  %v3285_v13 = vld [vmem:[#allocation2 + $0x8] sm:$0xff]  ;;  %v3302_v22 = vld [vmem:[#allocation2 + $0x58] sm:$0xff] }
  0xff   : > { %526 = vst.msk [vmem:[#allocation2 + $0x78] sm:$0xff] %vm317_vm0, %v2624_v44  ;;  %516 = vst.msk [vmem:[#allocation2 + $0x28] sm:$0xff] %vm317_vm0, %v2609_v45  ;;  %v502_v46 = vpop.f32.mrb[5].mxu1  ;;  %v452_v47 = vpop.f32.mrb[5].mxu0  ;;  %v3268_v5 = vld [vmem:[#allocation2] sm:$0xff]  ;;  %v3287_v14 = vld [vmem:[#allocation2 + $0x50] sm:$0xff] }
 0x100   : > { %525 = vst.msk [vmem:[#allocation2 + $0x70] sm:$0xff] %vm317_vm0, %v502_v46  ;;  %515 = vst.msk [vmem:[#allocation2 + $0x20] sm:$0xff] %vm317_vm0, %v452_v47 }
 0x102   : > { %v2612_v49 = vpop.f32.mrb[6].mxu0  ;;  %v602_v50 = vpop.f32.mrb[6].mxu1  ;;  %v3306_v24 = vld [vmem:[#allocation2 + $0x18] sm:$0xff]  ;;  %v3325_v34 = vld [vmem:[#allocation2 + $0x68] sm:$0xff] }
 0x103   : > { %518 = vst.msk [vmem:[#allocation2 + $0x38] sm:$0xff] %vm317_vm0, %v2612_v49  ;;  %v607_v51 = vcombine.high %v602_v50, %v602_v50  ;;  %v614_v52 = vrot.slane %v602_v50, %v613_v48  ;;  %v462_v53 = vpop.f32.mrb[7].mxu0  ;;  %v2635_v54 = vpop.f32.mrb[7].mxu1  ;;  %v3295_v18 = vld [vmem:[#allocation2 + $0x10] sm:$0xff]  ;;  %v3313_v27 = vld [vmem:[#allocation2 + $0x60] sm:$0xff] }
 0x104   : > { %517 = vst.msk [vmem:[#allocation2 + $0x30] sm:$0xff] %vm317_vm0, %v462_v53 }
 0x105   : > { %v621_v56 = vrot.slane %v607_v51, %v613_v48  ;;  %v622_v57 = vcombine.high %v614_v52, %v614_v52  ;;  %v630_v58 = vrot.slane %v614_v52, %v613_v48 }
 0x106   : > { %v2615_v59 = vpop.f32.mrb[8].mxu0  ;;  %v3270_v6 = vld [vmem:[#allocation2 + $0x28] sm:$0xff] }
 0x107   : > { %v623_v60 = vcombine.high %v621_v56, %v621_v56  ;;  %v3257_v61 = vrot.slane %v621_v56, %v613_v48  ;;  %v644_v62 = vrot.slane %v622_v57, %v613_v48  ;;  %520 = vst.msk [vmem:[#allocation2 + $0x48] sm:$0xff] %vm317_vm0, %v2615_v59  ;;  %v472_v63 = vpop.f32.mrb[9].mxu0  ;;  %v3260_v0 = vld [vmem:[#allocation2 + $0x20] sm:$0xff]  ;;  %v3263_v1 = vrot.slane %v630_v58, %v3254_v55  ;;  %v3337_v45 = vld [vmem:[#allocation2 + $0x70] sm:$0xff]  ;;  %v3353_v59 = vld [vmem:[#allocation2 + $0x78] sm:$0xff] }
 0x108   : > { %519 = vst.msk [vmem:[#allocation2 + $0x40] sm:$0xff] %vm317_vm0, %v472_v63  ;;  %v652_v19 = vcombine.high %v630_v58, %v630_v58 }
 0x109   : > { %v651_v2 = vrot.slane %v623_v60, %v613_v48  ;;  %v653_v3 = vcombine.high %v3257_v61, %v3257_v61  ;;  %v654_v4 = vcombine.high %v644_v62, %v644_v62  ;;  %v718_v7 = vadd.f32 %v3263_v1, %v3260_v0 }
 0x10a   : > { %v714_v8 = vadd.f32 %v3263_v1, %v3268_v5  ;;  %v719_v15 = vadd.f32 %v3263_v1, %v3270_v6  ;;  %v715_v16 = vadd.f32 %v3263_v1, %v3285_v13  ;;  %v724_v17 = vadd.f32 %v3263_v1, %v3287_v14 }
 0x10b   : > { %v655_v9 = vcombine.high %v651_v2, %v651_v2  ;;  %v3277_v10 = vrot.slane %v654_v4, %v3254_v55  ;;  %v3280_v11 = vrot.slane %v651_v2, %v3254_v55  ;;  %v3283_v12 = vrot.slane %v653_v3, %v3254_v55 }
 0x10c   : > { %2713 = vtanh.f32 %v718_v7  ;;  %v716_v21 = vadd.f32 %v3263_v1, %v3295_v18  ;;  %v725_v23 = vadd.f32 %v3263_v1, %v3302_v22  ;;  %v3309_v25 = vrot.slane %v652_v19, %v3254_v55 }
 0x10d   : > { %v3298_v20 = vrot.slane %v655_v9, %v3254_v55  ;;  %2715 = vtanh.f32 %v714_v8  ;;  %v717_v26 = vadd.f32 %v3263_v1, %v3306_v24  ;;  %v726_v29 = vadd.f32 %v3263_v1, %v3313_v27 }
 0x10e   : > { %2717 = vtanh.f32 %v719_v15  ;;  %v746_v30 = vadd.f32 %v3309_v25, %v3268_v5  ;;  %v3328_v36 = vrot.slane %v644_v62, %v3254_v55  ;;  %v727_v39 = vadd.f32 %v3263_v1, %v3325_v34 }
 0x10f   : > { %2719 = vtanh.f32 %v715_v16  ;;  %v748_v44 = vadd.f32 %v3309_v25, %v3295_v18  ;;  %v3343_v50 = vrot.slane %v3257_v61, %v3254_v55  ;;  %v728_v51 = vadd.f32 %v3263_v1, %v3337_v45 }
 0x110   : > { %2721 = vtanh.f32 %v724_v17  ;;  %v734_v54 = vadd.f32 %v3328_v36, %v3260_v0  ;;  %v729_v60 = vadd.f32 %v3263_v1, %v3353_v59  ;;  %v730_v8 = vadd.f32 %v3328_v36, %v3268_v5 }
 0x111   : > { %2723 = vtanh.f32 %v716_v21  ;;  %v779_v63 = vadd.f32 %v3343_v50, %v3285_v13  ;;  %v735_v16 = vadd.f32 %v3328_v36, %v3270_v6 }
 0x112   : > { %2725 = vtanh.f32 %v725_v23 }
 0x113   : > { %2727 = vtanh.f32 %v717_v26  ;;  %v731_v26 = vadd.f32 %v3328_v36, %v3285_v13 }
 0x114   : > { %2729 = vtanh.f32 %v726_v29 }
 0x115   : > { %2731 = vtanh.f32 %v746_v30 }
 0x116   : > { %v2714_v31 = vpop.eup %2713  ;;  %2733 = vtanh.f32 %v727_v39  ;;  %v732_v39 = vadd.f32 %v3328_v36, %v3295_v18 }
 0x117   : > { %v2716_v32 = vpop.eup %2715  ;;  %v980_v33 = vmul.f32 %v2714_v31, %v3318_v28  ;;  %2735 = vtanh.f32 %v748_v44  ;;  %v751_v31 = vadd.f32 %v3309_v25, %v3270_v6 }
 0x118   : > { %v2718_v35 = vpop.eup %2717  ;;  %v976_v38 = vmul.f32 %v2716_v32, %v3318_v28  ;;  %2737 = vtanh.f32 %v728_v51  ;;  %v747_v51 = vadd.f32 %v3309_v25, %v3285_v13 }
 0x119   : > { %v2720_v40 = vpop.eup %2719  ;;  %v1116_v41 = vsel %vm317_vm0, %v980_v33, 0.0  ;;  %v981_v42 = vmul.f32 %v2718_v35, %v3318_v28  ;;  %2739 = vtanh.f32 %v734_v54 }
 0x11a   : > { %v2722_v46 = vpop.eup %2721  ;;  %1117 = vadd.xlane.f32.xlu1 %v1116_v41  ;;  %v1104_v47 = vsel %vm317_vm0, %v976_v38, 0.0  ;;  %v977_v48 = vmul.f32 %v2720_v40, %v3318_v28  ;;  %2741 = vtanh.f32 %v729_v60  ;;  %v733_v60 = vadd.f32 %v3328_v36, %v3306_v24 }
 0x11b   : > { %v2724_v49 = vpop.eup %2723  ;;  %1105 = vadd.xlane.f32.xlu0 %v1104_v47  ;;  %v1119_v52 = vsel %vm317_vm0, %v981_v42, 0.0  ;;  %v986_v53 = vmul.f32 %v2722_v46, %v3318_v28  ;;  %2743 = vtanh.f32 %v779_v63  ;;  %v781_v42 = vadd.f32 %v3343_v50, %v3306_v24 }
 0x11c   : > { %v2726_v56 = vpop.eup %2725  ;;  %v1107_v57 = vsel %vm317_vm0, %v977_v48, 0.0  ;;  %v978_v58 = vmul.f32 %v2724_v49, %v3318_v28  ;;  %2745 = vtanh.f32 %v730_v8  ;;  %v3387_v48 = vld [vmem:[#allocation2 + $0x38] sm:$0xff]  ;;  %v782_v63 = vadd.f32 %v3343_v50, %v3260_v0 }
 0x11d   : > { %v2728_v55 = vpop.eup %2727  ;;  %v1134_v61 = vsel %vm317_vm0, %v986_v53, 0.0  ;;  %v987_v62 = vmul.f32 %v2726_v56, %v3318_v28  ;;  %2747 = vtanh.f32 %v735_v16  ;;  %v721_v54 = vadd.f32 %v3263_v1, %v3387_v48 }
 0x11e   : > { %1120 = vadd.xlane.f32.xlu1 %v1119_v52  ;;  %v2730_v2 = vpop.eup %2729  ;;  %v1110_v3 = vsel %vm317_vm0, %v978_v58, 0.0  ;;  %v979_v4 = vmul.f32 %v2728_v55, %v3318_v28  ;;  %2749 = vtanh.f32 %v731_v26  ;;  %v749_v8 = vadd.f32 %v3309_v25, %v3306_v24 }
 0x11f   : > { %1108 = vadd.xlane.f32.xlu0 %v1107_v57  ;;  %v2732_v7 = vpop.eup %2731  ;;  %v1137_v9 = vsel %vm317_vm0, %v987_v62, 0.0  ;;  %v988_v15 = vmul.f32 %v2730_v2, %v3318_v28  ;;  %2751 = vtanh.f32 %v751_v31  ;;  %v740_v16 = vadd.f32 %v3328_v36, %v3287_v14 }
 0x120   : > { %v2734_v17 = vpop.eup %2733  ;;  %v1113_v19 = vsel %vm317_vm0, %v979_v4, 0.0  ;;  %v1008_v21 = vmul.f32 %v2732_v7, %v3318_v28  ;;  %2753 = vtanh.f32 %v732_v39  ;;  %v778_v26 = vadd.f32 %v3343_v50, %v3268_v5 }
 0x121   : > { %v2736_v23 = vpop.eup %2735  ;;  %v1140_v29 = vsel %vm317_vm0, %v988_v15, 0.0  ;;  %v989_v30 = vmul.f32 %v2734_v17, %v3318_v28  ;;  %2755 = vtanh.f32 %v781_v42  ;;  %v741_v31 = vadd.f32 %v3328_v36, %v3302_v22 }
 0x122   : > { %1135 = vadd.xlane.f32.xlu1 %v1134_v61  ;;  %v2738_v32 = vpop.eup %2737  ;;  %v1200_v33 = vsel %vm317_vm0, %v1008_v21, 0.0  ;;  %v1010_v35 = vmul.f32 %v2736_v23, %v3318_v28  ;;  %2757 = vtanh.f32 %v747_v51  ;;  %v750_v39 = vadd.f32 %v3309_v25, %v3260_v0 }
 0x123   : > { %1111 = vadd.xlane.f32.xlu0 %v1110_v3  ;;  %v2740_v38 = vpop.eup %2739  ;;  %v1143_v40 = vsel %vm317_vm0, %v989_v30, 0.0  ;;  %v990_v41 = vmul.f32 %v2738_v32, %v3318_v28  ;;  %2759 = vtanh.f32 %v721_v54  ;;  %v742_v42 = vadd.f32 %v3328_v36, %v3313_v27 }
 0x124   : > { %v2742_v44 = vpop.eup %2741  ;;  %v1206_v46 = vsel %vm317_vm0, %v1010_v35, 0.0  ;;  %v996_v47 = vmul.f32 %v2740_v38, %v3318_v28  ;;  %2761 = vtanh.f32 %v733_v60  ;;  %v780_v51 = vadd.f32 %v3343_v50, %v3295_v18 }
 0x125   : > { %v2744_v49 = vpop.eup %2743  ;;  %v1146_v52 = vsel %vm317_vm0, %v990_v41, 0.0  ;;  %v991_v53 = vmul.f32 %v2742_v44, %v3318_v28  ;;  %2763 = vtanh.f32 %v782_v63  ;;  %v743_v54 = vadd.f32 %v3328_v36, %v3325_v34 }
 0x126   : > { %1138 = vadd.xlane.f32.xlu1 %v1137_v9  ;;  %v2746_v56 = vpop.eup %2745  ;;  %v1164_v57 = vsel %vm317_vm0, %v996_v47, 0.0  ;;  %v1041_v58 = vmul.f32 %v2744_v49, %v3318_v28  ;;  %2765 = vtanh.f32 %v749_v8  ;;  %v737_v60 = vadd.f32 %v3328_v36, %v3387_v48 }
 0x127   : > { %1114 = vadd.xlane.f32.xlu0 %v1113_v19  ;;  %v2748_v55 = vpop.eup %2747  ;;  %v1149_v61 = vsel %vm317_vm0, %v991_v53, 0.0  ;;  %v992_v62 = vmul.f32 %v2746_v56, %v3318_v28  ;;  %2767 = vtanh.f32 %v740_v16  ;;  %v744_v63 = vadd.f32 %v3328_v36, %v3337_v45 }
 0x128   : > { %v2750_v2 = vpop.eup %2749  ;;  %v1299_v3 = vsel %vm317_vm0, %v1041_v58, 0.0  ;;  %v997_v4 = vmul.f32 %v2748_v55, %v3318_v28  ;;  %2769 = vtanh.f32 %v778_v26  ;;  %v753_v8 = vadd.f32 %v3309_v25, %v3387_v48 }
 0x129   : > { %v2752_v7 = vpop.eup %2751  ;;  %v1152_v9 = vsel %vm317_vm0, %v992_v62, 0.0  ;;  %v993_v15 = vmul.f32 %v2750_v2, %v3318_v28  ;;  %2771 = vtanh.f32 %v741_v31  ;;  %v745_v16 = vadd.f32 %v3328_v36, %v3353_v59 }
 0x12a   : > { %1141 = vadd.xlane.f32.xlu1 %v1140_v29  ;;  %v2754_v17 = vpop.eup %2753  ;;  %v1167_v19 = vsel %vm317_vm0, %v997_v4, 0.0  ;;  %v1013_v21 = vmul.f32 %v2752_v7, %v3318_v28  ;;  %2773 = vtanh.f32 %v750_v39  ;;  %v783_v26 = vadd.f32 %v3343_v50, %v3270_v6 }
 0x12b   : > { %1201 = vadd.xlane.f32.xlu0 %v1200_v33  ;;  %v2756_v23 = vpop.eup %2755  ;;  %v1155_v29 = vsel %vm317_vm0, %v993_v15, 0.0  ;;  %v994_v30 = vmul.f32 %v2754_v17, %v3318_v28  ;;  %2775 = vtanh.f32 %v742_v42  ;;  %v792_v31 = vadd.f32 %v3343_v50, %v3337_v45 }
 0x12c   : > { %v2758_v32 = vpop.eup %2757  ;;  %v1215_v33 = vsel %vm317_vm0, %v1013_v21, 0.0  ;;  %v1043_v35 = vmul.f32 %v2756_v23, %v3318_v28  ;;  %2777 = vtanh.f32 %v780_v51  ;;  %v785_v39 = vadd.f32 %v3343_v50, %v3387_v48 }
 0x12d   : > { %v2760_v38 = vpop.eup %2759  ;;  %v1009_v41 = vmul.f32 %v2758_v32, %v3318_v28  ;;  %2779 = vtanh.f32 %v743_v54  ;;  %v793_v42 = vadd.f32 %v3343_v50, %v3353_v59 }
 0x12e   : > { %1144 = vadd.xlane.f32.xlu1 %v1143_v40  ;;  %v1158_v40 = vsel %vm317_vm0, %v994_v30, 0.0  ;;  %v2762_v44 = vpop.eup %2761  ;;  %v983_v47 = vmul.f32 %v2760_v38, %v3318_v28  ;;  %2781 = vtanh.f32 %v737_v60 }
 0x12f   : > { %1207 = vadd.xlane.f32.xlu0 %v1206_v46  ;;  %v1305_v46 = vsel %vm317_vm0, %v1043_v35, 0.0  ;;  %v2764_v49 = vpop.eup %2763  ;;  %v995_v53 = vmul.f32 %v2762_v44, %v3318_v28  ;;  %2783 = vtanh.f32 %v744_v63 }
 0x130   : > { %v2766_v56 = vpop.eup %2765  ;;  %v1044_v58 = vmul.f32 %v2764_v49, %v3318_v28  ;;  %2785 = vtanh.f32 %v753_v8  ;;  %v3469_v49 = vld [vmem:[#allocation2 + $0x30] sm:$0xff] }
 0x131   : > { %v2768_v55 = vpop.eup %2767  ;;  %v1011_v62 = vmul.f32 %v2766_v56, %v3318_v28  ;;  %2787 = vtanh.f32 %v745_v16  ;;  %v720_v56 = vadd.f32 %v3263_v1, %v3469_v49 }
 0x132   : > { %1147 = vadd.xlane.f32.xlu1 %v1146_v52  ;;  %v1203_v52 = vsel %vm317_vm0, %v1009_v41, 0.0  ;;  %v2770_v2 = vpop.eup %2769  ;;  %v1002_v4 = vmul.f32 %v2768_v55, %v3318_v28  ;;  %2789 = vtanh.f32 %v783_v26 }
 0x133   : > { %1165 = vadd.xlane.f32.xlu0 %v1164_v57  ;;  %v1125_v57 = vsel %vm317_vm0, %v983_v47, 0.0  ;;  %v2772_v7 = vpop.eup %2771  ;;  %v1040_v15 = vmul.f32 %v2770_v2, %v3318_v28  ;;  %2791 = vtanh.f32 %v792_v31  ;;  %v752_v2 = vadd.f32 %v3309_v25, %v3469_v49 }
 0x134   : > { %v2774_v17 = vpop.eup %2773  ;;  %v1003_v21 = vmul.f32 %v2772_v7, %v3318_v28  ;;  %2793 = vtanh.f32 %v785_v39 }
 0x135   : > { %v2776_v23 = vpop.eup %2775  ;;  %v1012_v30 = vmul.f32 %v2774_v17, %v3318_v28  ;;  %2795 = vtanh.f32 %v793_v42  ;;  %v763_v17 = vadd.f32 %v3277_v10, %v3285_v13 }
 0x136   : > { %1150 = vadd.xlane.f32.xlu1 %v1149_v61  ;;  %v1161_v61 = vsel %vm317_vm0, %v995_v53, 0.0  ;;  %v2778_v32 = vpop.eup %2777  ;;  %v1004_v35 = vmul.f32 %v2776_v23, %v3318_v28 }
 0x137   : > { %1300 = vadd.xlane.f32.xlu0 %v1299_v3  ;;  %v1308_v3 = vsel %vm317_vm0, %v1044_v58, 0.0  ;;  %v2780_v38 = vpop.eup %2779  ;;  %v1042_v41 = vmul.f32 %v2778_v32, %v3318_v28  ;;  %v764_v32 = vadd.f32 %v3277_v10, %v3295_v18 }
 0x138   : > { %v2782_v44 = vpop.eup %2781  ;;  %v1005_v47 = vmul.f32 %v2780_v38, %v3318_v28 }
 0x139   : > { %v2784_v51 = vpop.eup %2783  ;;  %v1302_v53 = vsel %vm317_vm0, %v1042_v41, 0.0  ;;  %v999_v54 = vmul.f32 %v2782_v44, %v3318_v28  ;;  %v765_v44 = vadd.f32 %v3277_v10, %v3306_v24 }
 0x13a   : > { %1153 = vadd.xlane.f32.xlu1 %v1152_v9  ;;  %v1209_v9 = vsel %vm317_vm0, %v1011_v62, 0.0  ;;  %v1191_v58 = vsel %vm317_vm0, %v1005_v47, 0.0  ;;  %v1006_v55 = vmul.f32 %v2784_v51, %v3318_v28 }
 0x13b   : > { %1168 = vadd.xlane.f32.xlu0 %v1167_v19  ;;  %v1182_v19 = vsel %vm317_vm0, %v1002_v4, 0.0  ;;  %v1173_v62 = vsel %vm317_vm0, %v999_v54, 0.0 }
 0x13c   : > { %v1194_v4 = vsel %vm317_vm0, %v1006_v55, 0.0 }
 0x13e   : > { %1156 = vadd.xlane.f32.xlu1 %v1155_v29  ;;  %v1296_v29 = vsel %vm317_vm0, %v1040_v15, 0.0 }
 0x13f   : > { %1216 = vadd.xlane.f32.xlu0 %v1215_v33  ;;  %v1185_v33 = vsel %vm317_vm0, %v1003_v21, 0.0 }
 0x142   : > { %1159 = vadd.xlane.f32.xlu1 %v1158_v40  ;;  %v1212_v40 = vsel %vm317_vm0, %v1012_v30, 0.0 }
 0x143   : > { %1306 = vadd.xlane.f32.xlu0 %v1305_v46  ;;  %v1188_v46 = vsel %vm317_vm0, %v1004_v35, 0.0 }
 0x146   : > { %1204 = vadd.xlane.f32.xlu1 %v1203_v52  ;;  %v756_v52 = vadd.f32 %v3309_v25, %v3287_v14 }
 0x147   : > { %1126 = vadd.xlane.f32.xlu0 %v1125_v57  ;;  %v2786_v57 = vpop.eup %2785 }
 0x148   : > { %v2788_v60 = vpop.eup %2787  ;;  %2797 = vtanh.f32 %v756_v52  ;;  %v1015_v63 = vmul.f32 %v2786_v57, %v3318_v28  ;;  %v794_v57 = vadd.f32 %v3280_v11, %v3268_v5 }
 0x149   : > { %2799 = vtanh.f32 %v720_v56  ;;  %v1007_v7 = vmul.f32 %v2788_v60, %v3318_v28 }
 0x14a   : > { %1162 = vadd.xlane.f32.xlu1 %v1161_v61  ;;  %v757_v61 = vadd.f32 %v3309_v25, %v3302_v22  ;;  %v1221_v15 = vsel %vm317_vm0, %v1015_v63, 0.0 }
 0x14b   : > { %1309 = vadd.xlane.f32.xlu0 %v1308_v3  ;;  %v2790_v3 = vpop.eup %2789  ;;  %v1197_v21 = vsel %vm317_vm0, %v1007_v7, 0.0 }
 0x14c   : > { %v2792_v8 = vpop.eup %2791  ;;  %2801 = vtanh.f32 %v757_v61  ;;  %v1045_v16 = vmul.f32 %v2790_v3, %v3318_v28  ;;  %v810_v3 = vadd.f32 %v3283_v12, %v3268_v5 }
 0x14d   : > { %2803 = vtanh.f32 %v752_v2  ;;  %v1054_v23 = vmul.f32 %v2792_v8, %v3318_v28 }
 0x14e   : > { %1210 = vadd.xlane.f32.xlu1 %v1209_v9  ;;  %v758_v9 = vadd.f32 %v3309_v25, %v3313_v27  ;;  %v1311_v30 = vsel %vm317_vm0, %v1045_v16, 0.0 }
 0x14f   : > { %1183 = vadd.xlane.f32.xlu0 %v1182_v19  ;;  %v2794_v19 = vpop.eup %2793  ;;  %v1338_v35 = vsel %vm317_vm0, %v1054_v23, 0.0 }
 0x150   : > { %v2796_v26 = vpop.eup %2795  ;;  %2805 = vtanh.f32 %v758_v9  ;;  %v1047_v31 = vmul.f32 %v2794_v19, %v3318_v28  ;;  %v812_v19 = vadd.f32 %v3283_v12, %v3295_v18 }
 0x151   : > { %2807 = vtanh.f32 %v763_v17  ;;  %v1055_v38 = vmul.f32 %v2796_v26, %v3318_v28 }
 0x152   : > { %1297 = vadd.xlane.f32.xlu1 %v1296_v29  ;;  %v788_v29 = vadd.f32 %v3343_v50, %v3287_v14  ;;  %v1317_v41 = vsel %vm317_vm0, %v1047_v31, 0.0 }
 0x153   : > { %1186 = vadd.xlane.f32.xlu0 %v1185_v33  ;;  %v2798_v33 = vpop.eup %2797  ;;  %v1341_v47 = vsel %vm317_vm0, %v1055_v38, 0.0 }
 0x154   : > { %v2800_v39 = vpop.eup %2799  ;;  %2809 = vtanh.f32 %v788_v29  ;;  %v1018_v42 = vmul.f32 %v2798_v33, %v3318_v28  ;;  %v768_v33 = vadd.f32 %v3277_v10, %v3469_v49 }
 0x155   : > { %2811 = vtanh.f32 %v764_v32  ;;  %v982_v51 = vmul.f32 %v2800_v39, %v3318_v28 }
 0x156   : > { %1213 = vadd.xlane.f32.xlu1 %v1212_v40  ;;  %v759_v40 = vadd.f32 %v3309_v25, %v3325_v34  ;;  %v1230_v54 = vsel %vm317_vm0, %v1018_v42, 0.0 }
 0x157   : > { %1189 = vadd.xlane.f32.xlu0 %v1188_v46  ;;  %v2802_v46 = vpop.eup %2801  ;;  %v1122_v55 = vsel %vm317_vm0, %v982_v51, 0.0 }
 0x158   : > { %v2804_v52 = vpop.eup %2803  ;;  %2813 = vtanh.f32 %v759_v40  ;;  %v1019_v56 = vmul.f32 %v2802_v46, %v3318_v28  ;;  %v798_v46 = vadd.f32 %v3280_v11, %v3260_v0 }
 0x159   : > { %2815 = vtanh.f32 %v765_v44  ;;  %v1014_v60 = vmul.f32 %v2804_v52, %v3318_v28 }
 0x15a   : > { %1303 = vadd.xlane.f32.xlu1 %v1302_v53  ;;  %v789_v53 = vadd.f32 %v3343_v50, %v3302_v22  ;;  %v1233_v63 = vsel %vm317_vm0, %v1019_v56, 0.0 }
 0x15b   : > { %1192 = vadd.xlane.f32.xlu0 %v1191_v58  ;;  %v2806_v58 = vpop.eup %2805  ;;  %v1218_v7 = vsel %vm317_vm0, %v1014_v60, 0.0 }
 0x15c   : > { %v2808_v61 = vpop.eup %2807  ;;  %2817 = vtanh.f32 %v789_v53  ;;  %v1020_v2 = vmul.f32 %v2806_v58, %v3318_v28  ;;  %v769_v58 = vadd.f32 %v3277_v10, %v3387_v48 }
 0x15d   : > { %2819 = vtanh.f32 %v794_v57  ;;  %v1025_v8 = vmul.f32 %v2808_v61, %v3318_v28 }
 0x15e   : > { %1174 = vadd.xlane.f32.xlu1 %v1173_v62  ;;  %v760_v62 = vadd.f32 %v3309_v25, %v3337_v45  ;;  %v1236_v16 = vsel %vm317_vm0, %v1020_v2, 0.0 }
 0x15f   : > { %1195 = vadd.xlane.f32.xlu0 %v1194_v4  ;;  %v2810_v4 = vpop.eup %2809  ;;  %v1251_v23 = vsel %vm317_vm0, %v1025_v8, 0.0 }
 0x160   : > { %v2812_v9 = vpop.eup %2811  ;;  %2821 = vtanh.f32 %v760_v62  ;;  %v1050_v17 = vmul.f32 %v2810_v4, %v3318_v28  ;;  %v799_v4 = vadd.f32 %v3280_v11, %v3270_v6 }
 0x161   : > { %2823 = vtanh.f32 %v810_v3  ;;  %v1026_v26 = vmul.f32 %v2812_v9, %v3318_v28 }
 0x162   : > { %1222 = vadd.xlane.f32.xlu1 %v1221_v15  ;;  %v790_v15 = vadd.f32 %v3343_v50, %v3313_v27  ;;  %v1326_v31 = vsel %vm317_vm0, %v1050_v17, 0.0 }
 0x163   : > { %1198 = vadd.xlane.f32.xlu0 %v1197_v21  ;;  %v2814_v21 = vpop.eup %2813  ;;  %v1254_v38 = vsel %vm317_vm0, %v1026_v26, 0.0 }
 0x164   : > { %v2816_v29 = vpop.eup %2815  ;;  %2825 = vtanh.f32 %v790_v15  ;;  %v1021_v32 = vmul.f32 %v2814_v21, %v3318_v28  ;;  %v800_v21 = vadd.f32 %v3280_v11, %v3469_v49 }
 0x165   : > { %2827 = vtanh.f32 %v812_v19  ;;  %v1027_v39 = vmul.f32 %v2816_v29, %v3318_v28 }
 0x166   : > { %1312 = vadd.xlane.f32.xlu1 %v1311_v30  ;;  %v761_v30 = vadd.f32 %v3309_v25, %v3353_v59  ;;  %v1239_v42 = vsel %vm317_vm0, %v1021_v32, 0.0 }
 0x167   : > { %1339 = vadd.xlane.f32.xlu0 %v1338_v35  ;;  %v2818_v35 = vpop.eup %2817  ;;  %v1257_v51 = vsel %vm317_vm0, %v1027_v39, 0.0 }
 0x168   : > { %v2820_v40 = vpop.eup %2819  ;;  %2829 = vtanh.f32 %v761_v30  ;;  %v1051_v44 = vmul.f32 %v2818_v35, %v3318_v28 }
 0x169   : > { %2831 = vtanh.f32 %v768_v33  ;;  %v1056_v52 = vmul.f32 %v2820_v40, %v3318_v28  ;;  %v801_v33 = vadd.f32 %v3280_v11, %v3387_v48 }
 0x16a   : > { %1318 = vadd.xlane.f32.xlu1 %v1317_v41  ;;  %v791_v41 = vadd.f32 %v3343_v50, %v3325_v34  ;;  %v1329_v56 = vsel %vm317_vm0, %v1051_v44, 0.0 }
 0x16b   : > { %1342 = vadd.xlane.f32.xlu0 %v1341_v47  ;;  %v2822_v47 = vpop.eup %2821  ;;  %v1344_v60 = vsel %vm317_vm0, %v1056_v52, 0.0 }
 0x16c   : > { %v2824_v53 = vpop.eup %2823  ;;  %2833 = vtanh.f32 %v791_v41  ;;  %v1022_v57 = vmul.f32 %v2822_v47, %v3318_v28  ;;  %v766_v41 = vadd.f32 %v3277_v10, %v3260_v0 }
 0x16d   : > { %2835 = vtanh.f32 %v798_v46  ;;  %v1072_v61 = vmul.f32 %v2824_v53, %v3318_v28  ;;  %v772_v46 = vadd.f32 %v3277_v10, %v3287_v14 }
 0x16e   : > { %1231 = vadd.xlane.f32.xlu1 %v1230_v54  ;;  %v736_v54 = vadd.f32 %v3328_v36, %v3469_v49  ;;  %v1242_v2 = vsel %vm317_vm0, %v1022_v57, 0.0 }
 0x16f   : > { %1123 = vadd.xlane.f32.xlu0 %v1122_v55  ;;  %v2826_v55 = vpop.eup %2825  ;;  %v1392_v8 = vsel %vm317_vm0, %v1072_v61, 0.0 }
 0x170   : > { %v2828_v62 = vpop.eup %2827  ;;  %2837 = vtanh.f32 %v736_v54  ;;  %v1052_v3 = vmul.f32 %v2826_v55, %v3318_v28  ;;  %v796_v54 = vadd.f32 %v3280_v11, %v3295_v18  ;;  %v811_v18 = vadd.f32 %v3283_v12, %v3285_v13 }
 0x171   : > { %2839 = vtanh.f32 %v769_v58  ;;  %v1074_v9 = vmul.f32 %v2828_v62, %v3318_v28  ;;  %v773_v58 = vadd.f32 %v3277_v10, %v3302_v22 }
 0x172   : > { %1234 = vadd.xlane.f32.xlu1 %v1233_v63  ;;  %v784_v63 = vadd.f32 %v3343_v50, %v3469_v49  ;;  %v1332_v17 = vsel %vm317_vm0, %v1052_v3, 0.0  ;;  %v774_v3 = vadd.f32 %v3277_v10, %v3313_v27 }
 0x173   : > { %1219 = vadd.xlane.f32.xlu0 %v1218_v7  ;;  %v2830_v7 = vpop.eup %2829  ;;  %v1398_v26 = vsel %vm317_vm0, %v1074_v9, 0.0 }
 0x174   : > { %v2832_v15 = vpop.eup %2831  ;;  %2841 = vtanh.f32 %v784_v63  ;;  %v1023_v19 = vmul.f32 %v2830_v7, %v3318_v28 }
 0x175   : > { %2843 = vtanh.f32 %v799_v4  ;;  %v1030_v29 = vmul.f32 %v2832_v15, %v3318_v28 }
 0x176   : > { %1237 = vadd.xlane.f32.xlu1 %v1236_v16  ;;  %v762_v16 = vadd.f32 %v3277_v10, %v3268_v5  ;;  %v795_v5 = vadd.f32 %v3280_v11, %v3285_v13  ;;  %v767_v13 = vadd.f32 %v3277_v10, %v3270_v6 }
 0x177   : > { %1252 = vadd.xlane.f32.xlu0 %v1251_v23  ;;  %v2834_v23 = vpop.eup %2833 }
 0x178   : > { %v2836_v30 = vpop.eup %2835  ;;  %2845 = vtanh.f32 %v762_v16  ;;  %v1053_v32 = vmul.f32 %v2834_v23, %v3318_v28 }
 0x179   : > { %2847 = vtanh.f32 %v800_v21  ;;  %v1060_v39 = vmul.f32 %v2836_v30, %v3318_v28 }
 0x17a   : > { %1327 = vadd.xlane.f32.xlu1 %v1326_v31  ;;  %v1245_v31 = vsel %vm317_vm0, %v1023_v19, 0.0  ;;  %v2838_v35 = vpop.eup %2837  ;;  %2849 = vtanh.f32 %v795_v5 }
 0x17b   : > { %1255 = vadd.xlane.f32.xlu0 %v1254_v38  ;;  %v1266_v38 = vsel %vm317_vm0, %v1030_v29, 0.0  ;;  %v2840_v40 = vpop.eup %2839  ;;  %v998_v44 = vmul.f32 %v2838_v35, %v3318_v28  ;;  %2851 = vtanh.f32 %v801_v33  ;;  %v797_v29 = vadd.f32 %v3280_v11, %v3306_v24 }
 0x17c   : > { %v1031_v52 = vmul.f32 %v2840_v40, %v3318_v28  ;;  %2853 = vtanh.f32 %v766_v41 }
 0x17d   : > { %2855 = vtanh.f32 %v772_v46 }
 0x17e   : > { %1240 = vadd.xlane.f32.xlu1 %v1239_v42  ;;  %v1335_v42 = vsel %vm317_vm0, %v1053_v32, 0.0  ;;  %v2842_v47 = vpop.eup %2841  ;;  %2857 = vtanh.f32 %v796_v54 }
 0x17f   : > { %1258 = vadd.xlane.f32.xlu0 %v1257_v51  ;;  %v1356_v51 = vsel %vm317_vm0, %v1060_v39, 0.0  ;;  %v2844_v53 = vpop.eup %2843  ;;  %v1046_v57 = vmul.f32 %v2842_v47, %v3318_v28  ;;  %2859 = vtanh.f32 %v773_v58  ;;  %v813_v39 = vadd.f32 %v3283_v12, %v3306_v24 }
 0x180   : > { %v1061_v61 = vmul.f32 %v2844_v53, %v3318_v28  ;;  %2861 = vtanh.f32 %v811_v18 }
 0x181   : > { %v1314_v63 = vsel %vm317_vm0, %v1046_v57, 0.0  ;;  %2863 = vtanh.f32 %v774_v3 }
 0x182   : > { %1330 = vadd.xlane.f32.xlu1 %v1329_v56  ;;  %v1170_v56 = vsel %vm317_vm0, %v998_v44, 0.0  ;;  %v2846_v55 = vpop.eup %2845  ;;  %v1359_v7 = vsel %vm317_vm0, %v1061_v61, 0.0  ;;  %2865 = vtanh.f32 %v767_v13 }
 0x183   : > { %1345 = vadd.xlane.f32.xlu0 %v1344_v60  ;;  %v1269_v60 = vsel %vm317_vm0, %v1031_v52, 0.0  ;;  %v2848_v62 = vpop.eup %2847  ;;  %v3639_v52 = vstv %s657_s29 }
 0x184   : > { %v2850_v4 = vpop.eup %2849 }
 0x185   : > { %v2852_v9 = vpop.eup %2851  ;;  %v1057_v16 = vmul.f32 %v2850_v4, %v3318_v28  ;;  %v815_v4 = vadd.f32 %v3283_v12, %v3270_v6 }
 0x186   : > { %1243 = vadd.xlane.f32.xlu1 %v1242_v2  ;;  %v1024_v2 = vmul.f32 %v2846_v55, %v3318_v28  ;;  %v2854_v19 = vpop.eup %2853  ;;  %v1063_v23 = vmul.f32 %v2852_v9, %v3318_v28 }
 0x187   : > { %1393 = vadd.xlane.f32.xlu0 %v1392_v8  ;;  %v1062_v8 = vmul.f32 %v2848_v62, %v3318_v28  ;;  %v1347_v30 = vsel %vm317_vm0, %v1057_v16, 0.0  ;;  %v1028_v5 = vmul.f32 %v2854_v19, %v3318_v28 }
 0x188   : > { %v1248_v15 = vsel %vm317_vm0, %v1024_v2, 0.0  ;;  %v1365_v32 = vsel %vm317_vm0, %v1063_v23, 0.0 }
 0x189   : > { %v1362_v21 = vsel %vm317_vm0, %v1062_v8, 0.0  ;;  %v1260_v40 = vsel %vm317_vm0, %v1028_v5, 0.0 }
 0x18a   : > { %1333 = vadd.xlane.f32.xlu1 %v1332_v17  ;;  %v804_v17 = vadd.f32 %v3280_v11, %v3287_v14  ;;  %v775_v14 = vadd.f32 %v3277_v10, %v3325_v34  ;;  %v805_v34 = vadd.f32 %v3280_v11, %v3302_v22  ;;  %v776_v22 = vadd.f32 %v3277_v10, %v3337_v45 }
 0x18b   : > { %1399 = vadd.xlane.f32.xlu0 %v1398_v26  ;;  %v2856_v26 = vpop.eup %2855 }
 0x18c   : > { %2867 = vtanh.f32 %v804_v17  ;;  %v1034_v33 = vmul.f32 %v2856_v26, %v3318_v28 }
 0x18d   : > { %2869 = vtanh.f32 %v797_v29 }
 0x18e   : > { %1246 = vadd.xlane.f32.xlu1 %v1245_v31  ;;  %v2858_v31 = vpop.eup %2857  ;;  %2871 = vtanh.f32 %v775_v14  ;;  %v1278_v44 = vsel %vm317_vm0, %v1034_v33, 0.0 }
 0x18f   : > { %1267 = vadd.xlane.f32.xlu0 %v1266_v38  ;;  %v2860_v35 = vpop.eup %2859  ;;  %v3624_v38 = vand.u32 127, %v611_v37  ;;  %v1058_v41 = vmul.f32 %v2858_v31, %v3318_v28  ;;  %2873 = vtanh.f32 %v813_v39 }
 0x190   : > { %v1035_v46 = vmul.f32 %v2860_v35, %v3318_v28  ;;  %2875 = vtanh.f32 %v805_v34 }
 0x191   : > { %4899 = vst [vmem:[#allocation7_spill] sm:$0xff] %v3624_v38  ;;  %v1751_v24 = vadd.s32 4294967288, %v3624_v38  ;;  %v1350_v54 = vsel %vm317_vm0, %v1058_v41, 0.0  ;;  %v3650_v61 = vsub.s32 %v3624_v38, %v3243_v43  ;;  %v1779_v2 = vadd.s32 4294967256, %v3624_v38 }
 0x192   : > { %1336 = vadd.xlane.f32.xlu1 %v1335_v42  ;;  %v2862_v42 = vpop.eup %2861  ;;  %v1281_v58 = vsel %vm317_vm0, %v1035_v46, 0.0  ;;  %v1765_v29 = vadd.s32 4294967272, %v3624_v38 }
 0x193   : > { %1357 = vadd.xlane.f32.xlu0 %v1356_v51  ;;  %v2864_v47 = vpop.eup %2863  ;;  %v814_v51 = vadd.f32 %v3283_v12, %v3260_v0  ;;  %v1758_v0 = vadd.s32 4294967280, %v3624_v38  ;;  %v3654_v18 = vsub.s32 %v1751_v24, %v3243_v43  ;;  %v3687_v41 = vsub.s32 %v1779_v2, %v3243_v43  ;;  %v3720_v2 = vld [vmem:[#allocation2 + $0x50] sm:$0xff] }
 0x194   : > { %v2866_v57 = vpop.eup %2865  ;;  %v1036_v55 = vmul.f32 %v2864_v47, %v3318_v28  ;;  %v3695_v47 = vsub.s32 %v1765_v29, %v3243_v43  ;;  %v817_v24 = vadd.f32 %v3283_v12, %v3387_v48  ;;  %v3712_v48 = vld [vmem:[%s4876_s4] ss:$0 sm:$0xff] }
 0x195   : > { %2877 = vtanh.f32 %v814_v51  ;;  %v1029_v13 = vmul.f32 %v2866_v57, %v3318_v28  ;;  %v3667_v17 = vsub.s32 %v1758_v0, %v3243_v43  ;;  %4901 = vst [vmem:[#allocation9_spill] sm:$0xff] %v3687_v41 }
 0x196   : > { %1171 = vadd.xlane.f32.xlu1 %v1170_v56  ;;  %v1073_v56 = vmul.f32 %v2862_v42, %v3318_v28  ;;  %2879 = vtanh.f32 %v776_v22  ;;  %v1284_v16 = vsel %vm317_vm0, %v1036_v55, 0.0 }
 0x197   : > { %1270 = vadd.xlane.f32.xlu0 %v1269_v60  ;;  %v2868_v60 = vpop.eup %2867  ;;  %2881 = vtanh.f32 %v815_v4  ;;  %v1263_v39 = vsel %vm317_vm0, %v1029_v13, 0.0 }
 0x198   : > { %v1395_v9 = vsel %vm317_vm0, %v1073_v56, 0.0  ;;  %v1066_v19 = vmul.f32 %v2868_v60, %v3318_v28 }
 0x19a   : > { %1315 = vadd.xlane.f32.xlu1 %v1314_v63  ;;  %v1772_v63 = vadd.s32 4294967264, %v3624_v38  ;;  %v1374_v34 = vsel %vm317_vm0, %v1066_v19, 0.0 }
 0x19b   : > { %1360 = vadd.xlane.f32.xlu0 %v1359_v7  ;;  %v2870_v7 = vpop.eup %2869 }
 0x19c   : > { %v2872_v6 = vpop.eup %2871  ;;  %v3678_v5 = vsub.s32 %v1772_v63, %v3243_v43  ;;  %v1059_v31 = vmul.f32 %v2870_v7, %v3318_v28 }
 0x19d   : > { %v1037_v42 = vmul.f32 %v2872_v6, %v3318_v28  ;;  %v3702_v28 = vld [vmem:[#allocation2 + $0x68] sm:$0xff] }
 0x19e   : > { %1249 = vadd.xlane.f32.xlu1 %v1248_v15  ;;  %v806_v15 = vadd.f32 %v3280_v11, %v3313_v27  ;;  %4900 = vst [vmem:[#allocation8_spill] sm:$0xff] %v3678_v5  ;;  %v1353_v22 = vsel %vm317_vm0, %v1059_v31, 0.0  ;;  %v3743_v31 = vld [vmem:[#allocation2 + $0x58] sm:$0xff] }
 0x19f   : > { %1363 = vadd.xlane.f32.xlu0 %v1362_v21  ;;  %v1287_v60 = vsel %vm317_vm0, %v1037_v42, 0.0 }
 0x1a0   : > { %2883 = vtanh.f32 %v806_v15 }
 0x1a2   : > { %1348 = vadd.xlane.f32.xlu1 %v1347_v30  ;;  %v816_v30 = vadd.f32 %v3283_v12, %v3469_v49 }
 0x1a3   : > { %1366 = vadd.xlane.f32.xlu0 %v1365_v32  ;;  %v822_v32 = vadd.f32 %v3283_v12, %v3313_v27 }
 0x1a4   : > { %2885 = vtanh.f32 %v816_v30 }
 0x1a5   : > { %2887 = vtanh.f32 %v822_v32  ;;  %v821_v32 = vadd.f32 %v3743_v31, %v3283_v12 }
 0x1a6   : > { %1261 = vadd.xlane.f32.xlu1 %v1260_v40  ;;  %v2874_v40 = vpop.eup %2873  ;;  %2889 = vtanh.f32 %v817_v24 }
 0x1a7   : > { %1279 = vadd.xlane.f32.xlu0 %v1278_v44  ;;  %v3634_v37 = vpop.xlane.xlu1 %1117  ;;  %v2876_v44 = vpop.eup %2875 }
 0x1a8   : > { %v1106_v53 = vpop.xlane.xlu0 %1105  ;;  %v1493_v51 = vadd.f32 %v3639_v52, %v3634_v37  ;;  %v2878_v56 = vpop.eup %2877  ;;  %v1075_v37 = vmul.f32 %v3712_v48, %v2874_v40  ;;  %v2977_v40 = vld [vmem:[#allocation2 + $0x8] sm:$0xff] }
 0x1a9   : > { %v1489_v45 = vadd.f32 %v3639_v52, %v1106_v53  ;;  %v2880_v0 = vpop.eup %2879 }
 0x1aa   : > { %1351 = vadd.xlane.f32.xlu1 %v1350_v54  ;;  %v823_v54 = vadd.f32 %v3702_v28, %v3283_v12  ;;  %v1776_v4 = vrot.slane %v1493_v51, %v3678_v5  ;;  %v1401_v15 = vsel %vm317_vm0, %v1075_v37, 0.0  ;;  %v2882_v19 = vpop.eup %2881 }
 0x1ab   : > { %1282 = vadd.xlane.f32.xlu0 %v1281_v58  ;;  %v1121_v62 = vpop.xlane.xlu1 %1120  ;;  %v1750_v21 = vrot.slane %v1489_v45, %v3650_v61  ;;  %v1067_v45 = vmul.f32 %v3712_v48, %v2876_v44  ;;  %v2884_v29 = vpop.eup %2883 }
 0x1ac   : > { %v1109_v3 = vpop.xlane.xlu0 %1108  ;;  %v1494_v57 = vadd.f32 %v3639_v52, %v1121_v62  ;;  %2891 = vtanh.f32 %v823_v54 }
 0x1ad   : > { %v1490_v8 = vadd.f32 %v3639_v52, %v1109_v3  ;;  %v820_v3 = vadd.f32 %v3720_v2, %v3283_v12 }
 0x1ae   : > { %1396 = vadd.xlane.f32.xlu1 %v1395_v9  ;;  %v1783_v9 = vrot.slane %v1494_v57, %v3687_v41 }
 0x1af   : > { %v1755_v23 = vrot.slane %v1490_v8, %v3654_v18  ;;  %1285 = vadd.xlane.f32.xlu0 %v1284_v16  ;;  %v3672_v26 = vpop.xlane.xlu1 %1135  ;;  %v809_v8 = vadd.f32 %v3280_v11, %v3353_v59  ;;  %v1076_v16 = vmul.f32 %v3712_v48, %v2878_v56  ;;  %2893 = vtanh.f32 %v820_v3 }
 0x1b0   : > { %v1112_v14 = vpop.xlane.xlu0 %1111 }
 0x1b1   : > { %v1757_v33 = vsel %vm1756_vm2, %v1755_v23, %v1750_v21  ;;  %v1491_v35 = vadd.f32 %v3639_v52, %v1112_v14  ;;  %v1377_v21 = vsel %vm317_vm0, %v1067_v45, 0.0  ;;  %v1038_v23 = vmul.f32 %v3712_v48, %v2880_v0  ;;  %v3765_v45 = vld [vmem:[#allocation2 + $0x48] sm:$0xff] }
 0x1b2   : > { %1264 = vadd.xlane.f32.xlu1 %v1263_v39  ;;  %v1077_v39 = vmul.f32 %v3712_v48, %v2882_v19  ;;  %2895 = vtanh.f32 %v809_v8 }
 0x1b3   : > { %v1762_v27 = vrot.slane %v1491_v35, %v3667_v17  ;;  %1375 = vadd.xlane.f32.xlu0 %v1374_v34  ;;  %v3692_v46 = vpop.xlane.xlu1 %1138  ;;  %v1404_v35 = vsel %vm317_vm0, %v1076_v16, 0.0  ;;  %v827_v34 = vadd.f32 %v2977_v40, %v3298_v20  ;;  %v1290_v44 = vsel %vm317_vm0, %v1038_v23, 0.0  ;;  %v3779_v23 = vld [vmem:[#allocation2 + $0x70] sm:$0xff] }
 0x1b4   : > { %v1115_v53 = vpop.xlane.xlu0 %1114  ;;  %2897 = vtanh.f32 %v821_v32  ;;  %v1407_v56 = vsel %vm317_vm0, %v1077_v39, 0.0 }
 0x1b5   : > { %v1764_v58 = vsel %vm1763_vm3, %v1762_v27, %v1757_v33  ;;  %v1492_v55 = vadd.f32 %v3639_v52, %v1115_v53  ;;  %v2886_v33 = vpop.eup %2885  ;;  %v1068_v27 = vmul.f32 %v3712_v48, %v2884_v29  ;;  %v3756_v53 = vld [vmem:[#allocation2 + $0x78] sm:$0xff]  ;;  %2899 = vtanh.f32 %v827_v34 }
 0x1b6   : > { %1354 = vadd.xlane.f32.xlu1 %v1353_v22  ;;  %v2888_v42 = vpop.eup %2887  ;;  %v777_v22 = vadd.f32 %v3756_v53, %v3277_v10  ;;  %v1078_v57 = vmul.f32 %v3712_v48, %v2886_v33  ;;  %v808_v29 = vadd.f32 %v3779_v23, %v3280_v11  ;;  %v2981_v33 = vld [vmem:[#allocation2 + $0x18] sm:$0xff] }
 0x1b7   : > { %v1769_v62 = vrot.slane %v1492_v55, %v3695_v47  ;;  %1288 = vadd.xlane.f32.xlu0 %v1287_v60  ;;  %v3718_v63 = vpop.xlane.xlu1 %1141  ;;  %v2890_v54 = vpop.eup %2889  ;;  %v1380_v0 = vsel %vm317_vm0, %v1068_v27, 0.0  ;;  %v1084_v60 = vmul.f32 %v3712_v48, %v2888_v42 }
 0x1b8   : > { %v3725_v7 = vpop.xlane.xlu0 %1201  ;;  %v2892_v37 = vpop.eup %2891  ;;  %2901 = vtanh.f32 %v777_v22  ;;  %v1410_v8 = vsel %vm317_vm0, %v1078_v57, 0.0 }
 0x1b9   : > { %v1771_v13 = vsel %vm1770_vm4, %v1769_v62, %v1764_v58  ;;  %v2979_v58 = vld [vmem:[#allocation2 + $0x10] sm:$0xff]  ;;  %v1428_v16 = vsel %vm317_vm0, %v1084_v60, 0.0  ;;  %v1085_v19 = vmul.f32 %v3712_v48, %v2892_v37 }
 0x1ba   : > { %v1778_v6 = vsel %vm1777_vm5, %v1776_v4, %v1771_v13  ;;  %1402 = vadd.xlane.f32.xlu1 %v1401_v15  ;;  %v828_v55 = vadd.f32 %v2979_v58, %v3298_v20  ;;  %v807_v4 = vadd.f32 %v3702_v28, %v3280_v11  ;;  %v739_v13 = vadd.f32 %v3328_v36, %v3765_v45  ;;  %v2894_v15 = vpop.eup %2893 }
 0x1bb   : > { %1378 = vadd.xlane.f32.xlu0 %v1377_v21  ;;  %v3736_v59 = vpop.xlane.xlu1 %1144  ;;  %v3739_v30 = vsel %vm1784_vm6, %v1783_v9, %v1778_v6  ;;  %v1079_v9 = vmul.f32 %v3712_v48, %v2890_v54  ;;  %v1082_v40 = vmul.f32 %v3712_v48, %v2894_v15  ;;  %v824_v58 = vadd.f32 %v3779_v23, %v3283_v12 }
 0x1bc   : > { %v3741_v14 = vpop.xlane.xlu0 %1207  ;;  %2903 = vtanh.f32 %v828_v55  ;;  %v2896_v6 = vpop.eup %2895 }
 0x1bd   : > { %2905 = vtanh.f32 %v807_v4  ;;  %v1413_v39 = vsel %vm317_vm0, %v1079_v9, 0.0  ;;  %v1071_v27 = vmul.f32 %v3712_v48, %v2896_v6  ;;  %v1422_v55 = vsel %vm317_vm0, %v1082_v40, 0.0 }
 0x1be   : > { %1405 = vadd.xlane.f32.xlu1 %v1404_v35  ;;  %v829_v35 = vadd.f32 %v2981_v33, %v3298_v20  ;;  %2907 = vtanh.f32 %v739_v13  ;;  %v2898_v34 = vpop.eup %2897  ;;  %v2983_v33 = vld [vmem:[#allocation2] sm:$0xff] }
 0x1bf   : > { %1291 = vadd.xlane.f32.xlu0 %v1290_v44  ;;  %v3752_v24 = vpop.xlane.xlu1 %1147  ;;  %v1431_v44 = vsel %vm317_vm0, %v1085_v19, 0.0  ;;  %v2900_v22 = vpop.eup %2899  ;;  %2909 = vtanh.f32 %v808_v29  ;;  %v1083_v37 = vmul.f32 %v3712_v48, %v2898_v34  ;;  %v1389_v13 = vsel %vm317_vm0, %v1071_v27, 0.0 }
 0x1c0   : > { %v3754_v51 = vpop.xlane.xlu0 %1165  ;;  %2911 = vtanh.f32 %v829_v35  ;;  %v1089_v15 = vmul.f32 %v3712_v48, %v2900_v22  ;;  %v826_v35 = vadd.f32 %v2983_v33, %v3298_v20  ;;  %v771_v34 = vadd.f32 %v3277_v10, %v3765_v45 }
 0x1c1   : > { %2913 = vtanh.f32 %v824_v58  ;;  %v1523_v58 = vadd.f32 %v3639_v52, %v3741_v14 }
 0x1c2   : > { %1408 = vadd.xlane.f32.xlu1 %v1407_v56  ;;  %v2902_v4 = vpop.eup %2901  ;;  %v1443_v22 = vsel %vm317_vm0, %v1089_v15, 0.0  ;;  %v832_v15 = vadd.f32 %v3298_v20, %v3469_v49  ;;  %v755_v49 = vadd.f32 %v3309_v25, %v3765_v45 }
 0x1c3   : > { %1381 = vadd.xlane.f32.xlu0 %v1380_v0  ;;  %v3767_v62 = vpop.xlane.xlu1 %1150  ;;  %v2982_v0 = vld [vmem:[#allocation2 + $0x20] sm:$0xff]  ;;  %v1039_v40 = vmul.f32 %v3712_v48, %v2902_v4 }
 0x1c4   : > { %v3769_v3 = vpop.xlane.xlu0 %1300  ;;  %v830_v60 = vadd.f32 %v2982_v0, %v3298_v20 }
 0x1c6   : > { %1411 = vadd.xlane.f32.xlu1 %v1410_v8  ;;  %2915 = vtanh.f32 %v830_v60 }
 0x1c7   : > { %1429 = vadd.xlane.f32.xlu0 %v1428_v16  ;;  %v1154_v21 = vpop.xlane.xlu1 %1153  ;;  %v2904_v16 = vpop.eup %2903  ;;  %2917 = vtanh.f32 %v826_v35  ;;  %v1947_v35 = vrot.slane %v1523_v58, %v3667_v17 }
 0x1c8   : > { %v3783_v32 = vpop.xlane.xlu0 %1168  ;;  %v1505_v42 = vadd.f32 %v3639_v52, %v1154_v21  ;;  %2919 = vtanh.f32 %v771_v34 }
 0x1c9   : > { %v1510_v34 = vadd.f32 %v3639_v52, %v3783_v32 }
 0x1ca   : > { %1414 = vadd.xlane.f32.xlu1 %v1413_v39  ;;  %v1859_v8 = vrot.slane %v1505_v42, %v3650_v61  ;;  %v1425_v39 = vsel %vm317_vm0, %v1083_v37, 0.0  ;;  %v2906_v42 = vpop.eup %2905  ;;  %v2984_v37 = vld [vmem:[#allocation2 + $0x28] sm:$0xff] }
 0x1cb   : > { %1432 = vadd.xlane.f32.xlu0 %v1431_v44  ;;  %v1157_v54 = vpop.xlane.xlu1 %1156  ;;  %v1521_v44 = vadd.f32 %v3639_v52, %v3725_v7  ;;  %v831_v0 = vadd.f32 %v2984_v37, %v3298_v20  ;;  %v1069_v14 = vmul.f32 %v3712_v48, %v2906_v42 }
 0x1cc   : > { %v1506_v56 = vadd.f32 %v3639_v52, %v1157_v54  ;;  %v3792_v57 = vpop.xlane.xlu0 %1216  ;;  %v1090_v54 = vmul.f32 %v3712_v48, %v2904_v16 }
 0x1cd   : > { %2921 = vtanh.f32 %v831_v0 }
 0x1ce   : > { %v1863_v9 = vrot.slane %v1506_v56, %v3654_v18  ;;  %1423 = vadd.xlane.f32.xlu1 %v1422_v55  ;;  %v2908_v56 = vpop.eup %2907 }
 0x1cf   : > { %1390 = vadd.xlane.f32.xlu0 %v1389_v13  ;;  %v1160_v19 = vpop.xlane.xlu1 %1159  ;;  %v1293_v13 = vsel %vm317_vm0, %v1039_v40, 0.0  ;;  %v1001_v33 = vmul.f32 %v3712_v48, %v2908_v56 }
 0x1d0   : > { %v1864_v6 = vsel %vm1756_vm2, %v1863_v9, %v1859_v8  ;;  %v1507_v21 = vadd.f32 %v3639_v52, %v1160_v19  ;;  %v3805_v29 = vpop.xlane.xlu0 %1306  ;;  %v723_v8 = vadd.f32 %v3263_v1, %v3765_v45  ;;  %v2910_v9 = vpop.eup %2909  ;;  %v1938_v19 = vrot.slane %v1521_v44, %v3650_v61 }
 0x1d1   : > { %v2912_v16 = vpop.eup %2911  ;;  %v1179_v32 = vsel %vm317_vm0, %v1001_v33, 0.0 }
 0x1d2   : > { %v1868_v27 = vrot.slane %v1507_v21, %v3667_v17  ;;  %1426 = vadd.xlane.f32.xlu1 %v1425_v39  ;;  %v1446_v21 = vsel %vm317_vm0, %v1090_v54, 0.0  ;;  %v1509_v39 = vadd.f32 %v3639_v52, %v3754_v51  ;;  %2923 = vtanh.f32 %v723_v8  ;;  %v2914_v58 = vpop.eup %2913 }
 0x1d3   : > { %1444 = vadd.xlane.f32.xlu0 %v1443_v22  ;;  %v1205_v55 = vpop.xlane.xlu1 %1204  ;;  %v1383_v22 = vsel %vm317_vm0, %v1069_v14, 0.0  ;;  %v1070_v54 = vmul.f32 %v3712_v48, %v2910_v9  ;;  %v1091_v56 = vmul.f32 %v3712_v48, %v2912_v16  ;;  %v2916_v37 = vpop.eup %2915  ;;  %2925 = vtanh.f32 %v832_v15 }
 0x1d4   : > { %v1869_v60 = vsel %vm1763_vm3, %v1868_v27, %v1864_v6  ;;  %v1522_v7 = vadd.f32 %v3639_v52, %v1205_v55  ;;  %v3822_v4 = vpop.xlane.xlu0 %1126  ;;  %v1878_v0 = vrot.slane %v1509_v39, %v3678_v5  ;;  %v803_v8 = vadd.f32 %v3280_v11, %v3765_v45 }
 0x1d5   : > { %v787_v9 = vadd.f32 %v3343_v50, %v3765_v45  ;;  %2927 = vtanh.f32 %v755_v49  ;;  %v1449_v15 = vsel %vm317_vm0, %v1091_v56, 0.0  ;;  %v1086_v33 = vmul.f32 %v3712_v48, %v2914_v58 }
 0x1d6   : > { %v1942_v6 = vrot.slane %v1522_v7, %v3654_v18  ;;  %1294 = vadd.xlane.f32.xlu1 %v1293_v13  ;;  %v1883_v13 = vrot.slane %v1510_v34, %v3687_v41  ;;  %v1554_v39 = vadd.f32 %v3639_v52, %v3769_v3  ;;  %v819_v3 = vadd.f32 %v3283_v12, %v3765_v45 }
 0x1d7   : > { %1447 = vadd.xlane.f32.xlu0 %v1446_v21  ;;  %v1163_v40 = vpop.xlane.xlu1 %1162  ;;  %v1386_v21 = vsel %vm317_vm0, %v1070_v54, 0.0  ;;  %2929 = vtanh.f32 %v787_v9  ;;  %v1434_v58 = vsel %vm317_vm0, %v1086_v33, 0.0 }
 0x1d8   : > { %v1943_v42 = vsel %vm1756_vm2, %v1942_v6, %v1938_v19  ;;  %v1508_v44 = vadd.f32 %v3639_v52, %v1163_v40  ;;  %v3843_v27 = vpop.xlane.xlu0 %1309  ;;  %2931 = vtanh.f32 %v803_v8  ;;  %v837_v8 = vadd.f32 %v3743_v31, %v3298_v20 }
 0x1d9   : > { %v1948_v51 = vsel %vm1763_vm3, %v1947_v35, %v1943_v42  ;;  %v2918_v35 = vpop.eup %2917  ;;  %2933 = vtanh.f32 %v819_v3 }
 0x1da   : > { %v1873_v55 = vrot.slane %v1508_v44, %v3695_v47  ;;  %1384 = vadd.xlane.f32.xlu1 %v1383_v22  ;;  %v2920_v49 = vpop.eup %2919 }
 0x1db   : > { %1180 = vadd.xlane.f32.xlu0 %v1179_v32  ;;  %v1211_v7 = vpop.xlane.xlu1 %1210  ;;  %v2922_v56 = vpop.eup %2921  ;;  %v2985_v32 = vld [vmem:[#allocation2 + $0x38] sm:$0xff] }
 0x1dc   : > { %v1874_v14 = vsel %vm1770_vm4, %v1873_v55, %v1869_v60  ;;  %v1524_v16 = vadd.f32 %v3639_v52, %v1211_v7  ;;  %v3859_v19 = vpop.xlane.xlu0 %1183  ;;  %v1092_v60 = vmul.f32 %v3712_v48, %v2916_v37  ;;  %v1088_v55 = vmul.f32 %v3712_v48, %v2918_v35 }
 0x1dd   : > { %v1879_v6 = vsel %vm1777_vm5, %v1878_v0, %v1874_v14  ;;  %v833_v37 = vadd.f32 %v2985_v32, %v3298_v20  ;;  %v2924_v0 = vpop.eup %2923  ;;  %v1526_v14 = vadd.f32 %v3639_v52, %v3792_v57  ;;  %v835_v57 = vadd.f32 %v3298_v20, %v3765_v45 }
 0x1de   : > { %v1952_v40 = vrot.slane %v1524_v16, %v3695_v47  ;;  %1387 = vadd.xlane.f32.xlu1 %v1386_v21  ;;  %v3870_v34 = vsel %vm1784_vm6, %v1883_v13, %v1879_v6  ;;  %v1452_v9 = vsel %vm317_vm0, %v1092_v60, 0.0  ;;  %v1033_v13 = vmul.f32 %v3712_v48, %v2920_v49  ;;  %v2926_v33 = vpop.eup %2925 }
 0x1df   : > { %1450 = vadd.xlane.f32.xlu0 %v1449_v15  ;;  %v1298_v42 = vpop.xlane.xlu1 %1297  ;;  %v1440_v35 = vsel %vm317_vm0, %v1088_v55, 0.0  ;;  %2935 = vtanh.f32 %v833_v37  ;;  %v1093_v49 = vmul.f32 %v3712_v48, %v2922_v56  ;;  %v1557_v45 = vadd.f32 %v3639_v52, %v3843_v27  ;;  %v2986_v37 = vld [vmem:[#allocation2 + $0x60] sm:$0xff] }
 0x1e0   : > { %v1953_v44 = vsel %vm1770_vm4, %v1952_v40, %v1948_v51  ;;  %v3873_v22 = vpop.xlane.xlu0 %1186  ;;  %v1553_v54 = vadd.f32 %v3639_v52, %v1298_v42  ;;  %v2100_v51 = vrot.slane %v1554_v39, %v3654_v18  ;;  %v985_v39 = vmul.f32 %v3712_v48, %v2924_v0  ;;  %v2928_v40 = vpop.eup %2927 }
 0x1e1   : > { %v1275_v31 = vsel %vm317_vm0, %v1033_v13, 0.0  ;;  %v1962_v42 = vrot.slane %v1526_v14, %v3687_v41  ;;  %2937 = vtanh.f32 %v837_v8  ;;  %v838_v0 = vadd.f32 %v2986_v37, %v3298_v20  ;;  %v2930_v27 = vpop.eup %2929 }
 0x1e2   : > { %v2096_v7 = vrot.slane %v1553_v54, %v3650_v61  ;;  %1435 = vadd.xlane.f32.xlu1 %v1434_v58  ;;  %v1556_v54 = vadd.f32 %v3639_v52, %v3805_v29  ;;  %v836_v58 = vadd.f32 %v3720_v2, %v3298_v20  ;;  %v1131_v29 = vsel %vm317_vm0, %v985_v39, 0.0  ;;  %v3917_v2 = vld [vmem:[#allocation2 + $0x40] sm:$0xff]  ;;  %v2932_v14 = vpop.eup %2931 }
 0x1e3   : > { %1453 = vadd.xlane.f32.xlu0 %v1452_v9  ;;  %v1214_v16 = vpop.xlane.xlu1 %1213  ;;  %2939 = vtanh.f32 %v835_v57  ;;  %v1455_v9 = vsel %vm317_vm0, %v1093_v49, 0.0  ;;  %v1094_v13 = vmul.f32 %v3712_v48, %v2926_v33  ;;  %v722_v57 = vadd.f32 %v3263_v1, %v3917_v2  ;;  %v2934_v49 = vpop.eup %2933 }
 0x1e4   : > { %v2101_v6 = vsel %vm1756_vm2, %v2100_v51, %v2096_v7  ;;  %v3890_v21 = vpop.xlane.xlu0 %1189  ;;  %v1525_v15 = vadd.f32 %v3639_v52, %v1214_v16  ;;  %v1017_v51 = vmul.f32 %v3712_v48, %v2928_v40  ;;  %v2110_v16 = vrot.slane %v1556_v54, %v3695_v47 }
 0x1e5   : > { %2941 = vtanh.f32 %v836_v58  ;;  %v770_v37 = vadd.f32 %v3277_v10, %v3917_v2 }
 0x1e6   : > { %v1957_v60 = vrot.slane %v1525_v15, %v3678_v5  ;;  %1441 = vadd.xlane.f32.xlu1 %v1440_v35  ;;  %v2115_v15 = vrot.slane %v1557_v45, %v3678_v5  ;;  %2943 = vtanh.f32 %v838_v0  ;;  %v1227_v33 = vsel %vm317_vm0, %v1017_v51, 0.0 }
 0x1e7   : > { %1276 = vadd.xlane.f32.xlu0 %v1275_v31  ;;  %v1304_v3 = vpop.xlane.xlu1 %1303  ;;  %v738_v31 = vadd.f32 %v3328_v36, %v3917_v2  ;;  %2945 = vtanh.f32 %v722_v57  ;;  %v754_v45 = vadd.f32 %v3309_v25, %v3917_v2 }
 0x1e8   : > { %v1958_v55 = vsel %vm1777_vm5, %v1957_v60, %v1953_v44  ;;  %v3908_v32 = vpop.xlane.xlu0 %1192  ;;  %v1555_v56 = vadd.f32 %v3639_v52, %v1304_v3  ;;  %v1049_v60 = vmul.f32 %v3712_v48, %v2930_v27 }
 0x1e9   : > { %v3915_v7 = vsel %vm1784_vm6, %v1962_v42, %v1958_v55  ;;  %v1458_v42 = vsel %vm317_vm0, %v1094_v13, 0.0  ;;  %v2936_v3 = vpop.eup %2935  ;;  %2947 = vtanh.f32 %v738_v31 }
 0x1ea   : > { %v2105_v44 = vrot.slane %v1555_v56, %v3667_v17  ;;  %1132 = vadd.xlane.f32.xlu1 %v1131_v29  ;;  %v1323_v36 = vsel %vm317_vm0, %v1049_v60, 0.0  ;;  %v1081_v56 = vmul.f32 %v3712_v48, %v2934_v49  ;;  %v1095_v29 = vmul.f32 %v3712_v48, %v2936_v3 }
 0x1eb   : > { %1456 = vadd.xlane.f32.xlu0 %v1455_v9  ;;  %v3923_v8 = vpop.xlane.xlu1 %1174  ;;  %v2938_v55 = vpop.eup %2937  ;;  %2949 = vtanh.f32 %v754_v45  ;;  %v786_v9 = vadd.f32 %v3343_v50, %v3917_v2  ;;  %v1786_v50 = vadd.s32 4294967248, %v3624_v38  ;;  %v1793_v60 = vadd.s32 4294967240, %v3624_v38 }
 0x1ec   : > { %v2106_v35 = vsel %vm1763_vm3, %v2105_v44, %v2101_v6  ;;  %v3927_v39 = vpop.xlane.xlu0 %1195  ;;  %v1065_v6 = vmul.f32 %v3712_v48, %v2932_v14  ;;  %v1419_v14 = vsel %vm317_vm0, %v1081_v56, 0.0  ;;  %v1099_v10 = vmul.f32 %v3712_v48, %v2938_v55 }
 0x1ed   : > { %v2111_v40 = vsel %vm1770_vm4, %v2110_v16, %v2106_v35  ;;  %v2940_v51 = vpop.eup %2939  ;;  %2951 = vtanh.f32 %v770_v37  ;;  %v802_v16 = vadd.f32 %v3280_v11, %v3917_v2  ;;  %v1461_v57 = vsel %vm317_vm0, %v1095_v29, 0.0 }
 0x1ee   : > { %1228 = vadd.xlane.f32.xlu1 %v1227_v33  ;;  %v2116_v54 = vsel %vm1777_vm5, %v2115_v15, %v2111_v40  ;;  %v1371_v0 = vsel %vm317_vm0, %v1065_v6, 0.0  ;;  %v1097_v40 = vmul.f32 %v3712_v48, %v2940_v51  ;;  %2953 = vtanh.f32 %v786_v9 }
 0x1ef   : > { %1459 = vadd.xlane.f32.xlu0 %v1458_v42  ;;  %v3939_v1 = vpop.xlane.xlu1 %1222  ;;  %v2942_v13 = vpop.eup %2941  ;;  %v818_v11 = vadd.f32 %v3283_v12, %v3917_v2  ;;  %v1473_v42 = vsel %vm317_vm0, %v1099_v10, 0.0  ;;  %2955 = vtanh.f32 %v802_v16  ;;  %v834_v3 = vadd.f32 %v3298_v20, %v3917_v2 }
 0x1f0   : > { %v3941_v58 = vpop.xlane.xlu0 %1198  ;;  %v2944_v15 = vpop.eup %2943  ;;  %v1467_v55 = vsel %vm317_vm0, %v1097_v40, 0.0  ;;  %v3981_v56 = vsub.s32 %v1786_v50, %v3243_v43  ;;  %v3988_v29 = vsub.s32 %v1793_v60, %v3243_v43  ;;  %v1496_v2 = vadd.f32 %v3639_v52, %v3822_v4 }
 0x1f1   : > { %v1100_v6 = vmul.f32 %v3712_v48, %v2944_v15  ;;  %v2946_v45 = vpop.eup %2945  ;;  %2957 = vtanh.f32 %v818_v11  ;;  %v841_v50 = vadd.f32 %v3756_v53, %v3298_v20 }
 0x1f2   : > { %1324 = vadd.xlane.f32.xlu1 %v1323_v36  ;;  %4902 = vst [vmem:[#allocation10_spill] sm:$0xff] %v3981_v56  ;;  %4903 = vst [vmem:[#allocation11_spill] sm:$0xff] %v3988_v29  ;;  %2959 = vtanh.f32 %v834_v3 }
 0x1f3   : > { %1372 = vadd.xlane.f32.xlu0 %v1371_v0  ;;  %v1313_v27 = vpop.xlane.xlu1 %1312  ;;  %v2948_v36 = vpop.eup %2947  ;;  %v839_v0 = vadd.f32 %v3702_v28, %v3298_v20  ;;  %v1476_v9 = vsel %vm317_vm0, %v1100_v6, 0.0 }
 0x1f4   : > { %v3951_v44 = vpop.xlane.xlu0 %1339  ;;  %v1558_v25 = vadd.f32 %v3639_v52, %v1313_v27  ;;  %v825_v27 = vadd.f32 %v3756_v53, %v3283_v12  ;;  %v1000_v10 = vmul.f32 %v3712_v48, %v2948_v36  ;;  %v840_v12 = vadd.f32 %v3779_v23, %v3298_v20 }
 0x1f5   : > { %2961 = vtanh.f32 %v839_v0 }
 0x1f6   : > { %v2120_v35 = vrot.slane %v1558_v25, %v3687_v41  ;;  %1420 = vadd.xlane.f32.xlu1 %v1419_v14  ;;  %v2950_v14 = vpop.eup %2949  ;;  %2963 = vtanh.f32 %v825_v27  ;;  %v1176_v3 = vsel %vm317_vm0, %v1000_v10, 0.0 }
 0x1f7   : > { %1462 = vadd.xlane.f32.xlu0 %v1461_v57  ;;  %v3963_v33 = vpop.xlane.xlu1 %1318  ;;  %v2952_v4 = vpop.eup %2951  ;;  %v1528_v57 = vadd.f32 %v3639_v52, %v3939_v1  ;;  %v1016_v23 = vmul.f32 %v3712_v48, %v2950_v14  ;;  %2965 = vtanh.f32 %v841_v50 }
 0x1f8   : > { %v3968_v31 = vsel %vm1784_vm6, %v2120_v35, %v2116_v54  ;;  %v3970_v49 = vpop.xlane.xlu0 %1342  ;;  %v1098_v54 = vmul.f32 %v3712_v48, %v2942_v13  ;;  %v984_v13 = vmul.f32 %v3712_v48, %v2946_v45  ;;  %v1797_v35 = vrot.slane %v1496_v2, %v3988_v29  ;;  %v2954_v6 = vpop.eup %2953 }
 0x1f9   : > { %v1032_v1 = vmul.f32 %v3712_v48, %v2952_v4  ;;  %v1972_v53 = vrot.slane %v1528_v57, %v3988_v29  ;;  %v1224_v0 = vsel %vm317_vm0, %v1016_v23, 0.0  ;;  %v1048_v2 = vmul.f32 %v3712_v48, %v2954_v6 }
 0x1fa   : > { %1474 = vadd.xlane.f32.xlu1 %v1473_v42  ;;  %v1470_v28 = vsel %vm317_vm0, %v1098_v54, 0.0  ;;  %v1128_v42 = vsel %vm317_vm0, %v984_v13, 0.0  ;;  %2967 = vtanh.f32 %v840_v12 }
 0x1fb   : > { %1468 = vadd.xlane.f32.xlu0 %v1467_v55  ;;  %v3983_v37 = vpop.xlane.xlu1 %1231  ;;  %v2956_v55 = vpop.eup %2955  ;;  %v1272_v27 = vsel %vm317_vm0, %v1032_v1, 0.0  ;;  %v1320_v10 = vsel %vm317_vm0, %v1048_v2, 0.0 }
 0x1fc   : > { %v1124_v51 = vpop.xlane.xlu0 %1123 }
 0x1fd   : > { %v1495_v25 = vadd.f32 %v3639_v52, %v1124_v51  ;;  %v2958_v51 = vpop.eup %2957 }
 0x1fe   : > { %1477 = vadd.xlane.f32.xlu1 %v1476_v9  ;;  %v2960_v13 = vpop.eup %2959  ;;  %v1080_v4 = vmul.f32 %v3712_v48, %v2958_v51 }
 0x1ff   : > { %v1790_v16 = vrot.slane %v1495_v25, %v3981_v56  ;;  %1471 = vadd.xlane.f32.xlu0 %v1470_v28  ;;  %v4000_v15 = vpop.xlane.xlu1 %1234  ;;  %v1064_v25 = vmul.f32 %v3712_v48, %v2956_v55 }
 0x200   : > { %v1220_v40 = vpop.xlane.xlu0 %1219  ;;  %v1416_v50 = vsel %vm317_vm0, %v1080_v4, 0.0 }
 0x201   : > { %v1792_v60 = vsel %vm1791_vm7, %v1790_v16, %v3739_v30  ;;  %v1527_v11 = vadd.f32 %v3639_v52, %v1220_v40  ;;  %v1368_v12 = vsel %vm317_vm0, %v1064_v25, 0.0 }
 0x202   : > { %1129 = vadd.xlane.f32.xlu1 %v1128_v42  ;;  %v4017_v45 = vsel %vm1798_vm8, %v1797_v35, %v1792_v60  ;;  %v1096_v35 = vmul.f32 %v3712_v48, %v2960_v13 }
 0x203   : > { %4904 = vst [vmem:[#allocation12_spill] sm:$0xff] %v4017_v45  ;;  %v1967_v20 = vrot.slane %v1527_v11, %v3981_v56  ;;  %1177 = vadd.xlane.f32.xlu0 %v1176_v3  ;;  %v4020_v30 = vpop.xlane.xlu1 %1237 }
 0x204   : > { %v4023_v54 = vpop.xlane.xlu0 %1252  ;;  %v1464_v42 = vsel %vm317_vm0, %v1096_v35, 0.0 }
 0x205   : > { %v1968_v36 = vsel %vm1791_vm7, %v1967_v20, %v3915_v7  ;;  %v2962_v7 = vpop.eup %2961 }
 0x206   : > { %1225 = vadd.xlane.f32.xlu1 %v1224_v0  ;;  %v4032_v9 = vsel %vm1798_vm8, %v1972_v53, %v1968_v36  ;;  %v2964_v16 = vpop.eup %2963  ;;  %v1101_v23 = vmul.f32 %v3712_v48, %v2962_v7 }
 0x207   : > { %4905 = vst [vmem:[#allocation13_spill] sm:$0xff] %v4032_v9  ;;  %1273 = vadd.xlane.f32.xlu0 %v1272_v27  ;;  %v4034_v14 = vpop.xlane.xlu1 %1327  ;;  %v1087_v60 = vmul.f32 %v3712_v48, %v2964_v16  ;;  %v2966_v11 = vpop.eup %2965  ;;  %v1849_v9 = vadd.s32 4294967176, %v3624_v38 }
 0x208   : > { %v1256_v28 = vpop.xlane.xlu0 %1255  ;;  %v2968_v6 = vpop.eup %2967  ;;  %v1103_v20 = vmul.f32 %v3712_v48, %v2966_v11  ;;  %v1479_v53 = vsel %vm317_vm0, %v1101_v23, 0.0 }
 0x209   : > { %v1437_v55 = vsel %vm317_vm0, %v1087_v60, 0.0  ;;  %v1102_v36 = vmul.f32 %v3712_v48, %v2968_v6  ;;  %v1512_v48 = vadd.f32 %v3639_v52, %v3923_v8 }
 0x20a   : > { %1321 = vadd.xlane.f32.xlu1 %v1320_v10  ;;  %v1485_v51 = vsel %vm317_vm0, %v1103_v20, 0.0 }
 0x20b   : > { %1369 = vadd.xlane.f32.xlu0 %v1368_v12  ;;  %v4040_v57 = vpop.xlane.xlu1 %1240  ;;  %v1482_v27 = vsel %vm317_vm0, %v1102_v36, 0.0  ;;  %v1893_v11 = vrot.slane %v1512_v48, %v3988_v29  ;;  %vm1854_vm0 = vcmask 1048512  }
 0x20c   : > { %v1259_v40 = vpop.xlane.xlu0 %1258 }
 0x20d   : > { %v1540_v48 = vadd.f32 %v3639_v52, %v1259_v40 }
 0x20e   : > { %1417 = vadd.xlane.f32.xlu1 %v1416_v50 }
 0x20f   : > { %1465 = vadd.xlane.f32.xlu0 %v1464_v42  ;;  %v4046_v3 = vpop.xlane.xlu1 %1330  ;;  %v1560_v42 = vadd.f32 %v3639_v52, %v3963_v33  ;;  %v2031_v40 = vrot.slane %v1540_v48, %v3695_v47 }
 0x210   : > { %v1346_v1 = vpop.xlane.xlu0 %1345 }
 0x212   : > { %1438 = vadd.xlane.f32.xlu1 %v1437_v55 }
 0x213   : > { %1480 = vadd.xlane.f32.xlu0 %v1479_v53  ;;  %v4052_v0 = vpop.xlane.xlu1 %1243  ;;  %v1538_v53 = vadd.f32 %v3639_v52, %v4023_v54 }
 0x214   : > { %v1394_v2 = vpop.xlane.xlu0 %1393 }
 0x215   : > { %v2021_v54 = vrot.slane %v1538_v53, %v3654_v18 }
 0x216   : > { %1486 = vadd.xlane.f32.xlu1 %v1485_v51  ;;  %v2130_v51 = vrot.slane %v1560_v42, %v3988_v29 }
 0x217   : > { %1483 = vadd.xlane.f32.xlu0 %v1482_v27  ;;  %v4056_v25 = vpop.xlane.xlu1 %1333  ;;  %v1539_v27 = vadd.f32 %v3639_v52, %v1256_v28 }
 0x218   : > { %v1400_v13 = vpop.xlane.xlu0 %1399 }
 0x219   : > { %v2026_v28 = vrot.slane %v1539_v27, %v3667_v17 }
 0x21b   : > { %v4058_v7 = vpop.xlane.xlu1 %1246 }
 0x21c   : > { %v1268_v10 = vpop.xlane.xlu0 %1267 }
 0x21f   : > { %v4060_v4 = vpop.xlane.xlu1 %1336 }
 0x220   : > { %v4062_v16 = vpop.xlane.xlu0 %1357 }
 0x223   : > { %v1172_v12 = vpop.xlane.xlu1 %1171 }
 0x224   : > { %v1511_v35 = vadd.f32 %v3639_v52, %v1172_v12  ;;  %v1271_v50 = vpop.xlane.xlu0 %1270 }
 0x226   : > { %v1888_v60 = vrot.slane %v1511_v35, %v3981_v56 }
 0x227   : > { %v1316_v23 = vpop.xlane.xlu1 %1315 }
 0x228   : > { %v1889_v6 = vsel %vm1791_vm7, %v1888_v60, %v3870_v34  ;;  %v1559_v55 = vadd.f32 %v3639_v52, %v1316_v23  ;;  %v1361_v20 = vpop.xlane.xlu0 %1360 }
 0x229   : > { %v4075_v8 = vsel %vm1798_vm8, %v1893_v11, %v1889_v6  ;;  %v1569_v11 = vadd.f32 %v3639_v52, %v1346_v1 }
 0x22a   : > { %4906 = vst [vmem:[#allocation14_spill] sm:$0xff] %v4075_v8  ;;  %v2125_v36 = vrot.slane %v1559_v55, %v3981_v56 }
 0x22b   : > { %v1250_v33 = vpop.xlane.xlu1 %1249 }
 0x22c   : > { %v2126_v34 = vsel %vm1791_vm7, %v2125_v36, %v3968_v31  ;;  %v1537_v12 = vadd.f32 %v3639_v52, %v1250_v33  ;;  %v1364_v35 = vpop.xlane.xlu0 %1363 }
 0x22d   : > { %v4087_v60 = vsel %vm1798_vm8, %v2130_v51, %v2126_v34  ;;  %v2175_v51 = vrot.slane %v1569_v11, %v3650_v61  ;;  %v1585_v11 = vadd.f32 %v3639_v52, %v1394_v2 }
 0x22e   : > { %4907 = vst [vmem:[#allocation15_spill] sm:$0xff] %v4087_v60  ;;  %v2017_v42 = vrot.slane %v1537_v12, %v3650_v61 }
 0x22f   : > { %v1349_v23 = vpop.xlane.xlu1 %1348 }
 0x230   : > { %v2022_v6 = vsel %vm1756_vm2, %v2021_v54, %v2017_v42  ;;  %v1570_v31 = vadd.f32 %v3639_v52, %v1349_v23  ;;  %v1367_v55 = vpop.xlane.xlu0 %1366 }
 0x231   : > { %v2027_v36 = vsel %vm1763_vm3, %v2026_v28, %v2022_v6  ;;  %v1587_v6 = vadd.f32 %v3639_v52, %v1400_v13 }
 0x232   : > { %v2179_v53 = vrot.slane %v1570_v31, %v3654_v18  ;;  %v2032_v1 = vsel %vm1770_vm4, %v2031_v40, %v2027_v36 }
 0x233   : > { %v1262_v33 = vpop.xlane.xlu1 %1261 }
 0x234   : > { %v2180_v34 = vsel %vm1756_vm2, %v2179_v53, %v2175_v51  ;;  %v1541_v27 = vadd.f32 %v3639_v52, %v1262_v33  ;;  %v4102_v12 = vpop.xlane.xlu0 %1279  ;;  %v2254_v33 = vrot.slane %v1585_v11, %v3650_v61 }
 0x236   : > { %v2036_v48 = vrot.slane %v1541_v27, %v3678_v5  ;;  %v2263_v27 = vrot.slane %v1587_v6, %v3667_v17  ;;  %v1573_v6 = vadd.f32 %v3639_v52, %v4062_v16 }
 0x237   : > { %v1352_v54 = vpop.xlane.xlu1 %1351 }
 0x238   : > { %v2037_v42 = vsel %vm1777_vm5, %v2036_v48, %v2032_v1  ;;  %v1571_v28 = vadd.f32 %v3639_v52, %v1352_v54  ;;  %v4107_v23 = vpop.xlane.xlu0 %1282  ;;  %v1543_v48 = vadd.f32 %v3639_v52, %v1268_v10  ;;  %v1544_v54 = vadd.f32 %v3639_v52, %v1271_v50 }
 0x239   : > { %v1574_v50 = vadd.f32 %v3639_v52, %v1361_v20 }
 0x23a   : > { %v2184_v40 = vrot.slane %v1571_v28, %v3667_v17  ;;  %v2046_v11 = vrot.slane %v1543_v48, %v3981_v56  ;;  %v2051_v10 = vrot.slane %v1544_v54, %v3988_v29  ;;  %v1576_v48 = vadd.f32 %v3639_v52, %v1367_v55 }
 0x23b   : > { %v1397_v31 = vpop.xlane.xlu1 %1396  ;;  %v2194_v54 = vrot.slane %v1573_v6, %v3678_v5 }
 0x23c   : > { %v2185_v36 = vsel %vm1763_vm3, %v2184_v40, %v2180_v34  ;;  %v1586_v51 = vadd.f32 %v3639_v52, %v1397_v31  ;;  %v4114_v53 = vpop.xlane.xlu0 %1285 }
 0x23e   : > { %v2258_v1 = vrot.slane %v1586_v51, %v3654_v18 }
 0x23f   : > { %v1265_v2 = vpop.xlane.xlu1 %1264 }
 0x240   : > { %v2259_v13 = vsel %vm1756_vm2, %v2258_v1, %v2254_v33  ;;  %v1542_v28 = vadd.f32 %v3639_v52, %v1265_v2  ;;  %v4123_v34 = vpop.xlane.xlu0 %1375 }
 0x241   : > { %v2264_v40 = vsel %vm1763_vm3, %v2263_v27, %v2259_v13  ;;  %v1575_v27 = vadd.f32 %v3639_v52, %v1364_v35 }
 0x242   : > { %v2041_v31 = vrot.slane %v1542_v28, %v3687_v41 }
 0x243   : > { %v1355_v51 = vpop.xlane.xlu1 %1354  ;;  %v2204_v35 = vrot.slane %v1575_v27, %v3981_v56 }
 0x244   : > { %v2042_v33 = vsel %vm1784_vm6, %v2041_v31, %v2037_v42  ;;  %v1572_v1 = vadd.f32 %v3639_v52, %v1355_v51  ;;  %v4134_v2 = vpop.xlane.xlu0 %1288  ;;  %v2199_v42 = vrot.slane %v1574_v50, %v3687_v41 }
 0x245   : > { %v2047_v13 = vsel %vm1791_vm7, %v2046_v11, %v2042_v33  ;;  %v2209_v11 = vrot.slane %v1576_v48, %v3988_v29 }
 0x246   : > { %v2189_v28 = vrot.slane %v1572_v1, %v3695_v47  ;;  %v4141_v16 = vsel %vm1798_vm8, %v2051_v10, %v2047_v13 }
 0x247   : > { %4908 = vst [vmem:[#allocation16_spill] sm:$0xff] %v4141_v16  ;;  %v1403_v20 = vpop.xlane.xlu1 %1402 }
 0x248   : > { %v2190_v31 = vsel %vm1770_vm4, %v2189_v28, %v2185_v36  ;;  %v1588_v51 = vadd.f32 %v3639_v52, %v1403_v20  ;;  %v4147_v60 = vpop.xlane.xlu0 %1378 }
 0x249   : > { %v2195_v55 = vsel %vm1777_vm5, %v2194_v54, %v2190_v31 }
 0x24a   : > { %v2200_v10 = vsel %vm1784_vm6, %v2199_v42, %v2195_v55  ;;  %v2268_v33 = vrot.slane %v1588_v51, %v3695_v47 }
 0x24b   : > { %v1406_v6 = vpop.xlane.xlu1 %1405  ;;  %v2205_v1 = vsel %vm1791_vm7, %v2204_v35, %v2200_v10 }
 0x24c   : > { %v2269_v50 = vsel %vm1770_vm4, %v2268_v33, %v2264_v40  ;;  %v1589_v36 = vadd.f32 %v3639_v52, %v1406_v6  ;;  %v4157_v13 = vpop.xlane.xlu0 %1291  ;;  %v4160_v28 = vsel %vm1798_vm8, %v2209_v11, %v2205_v1 }
 0x24d   : > { %4909 = vst [vmem:[#allocation17_spill] sm:$0xff] %v4160_v28  ;;  %v1842_v28 = vadd.s32 4294967184, %v3624_v38 }
 0x24e   : > { %v2273_v27 = vrot.slane %v1589_v36, %v3678_v5 }
 0x24f   : > { %v1409_v54 = vpop.xlane.xlu1 %1408 }
 0x250   : > { %v2274_v48 = vsel %vm1777_vm5, %v2273_v27, %v2269_v50  ;;  %v1590_v20 = vadd.f32 %v3639_v52, %v1409_v54  ;;  %v4165_v42 = vpop.xlane.xlu0 %1381 }
 0x252   : > { %v2278_v31 = vrot.slane %v1590_v20, %v3687_v41  ;;  %v4223_v41 = vadd.f32 %v3639_v52, %v3692_v46  ;;  %v4244_v46 = vadd.f32 %v3639_v52, %v3752_v24  ;;  %v4263_v24 = vadd.f32 %v3639_v52, %v3873_v22 }
 0x253   : > { %v1412_v51 = vpop.xlane.xlu1 %1411 }
 0x254   : > { %v2279_v40 = vsel %vm1784_vm6, %v2278_v31, %v2274_v48  ;;  %v1591_v35 = vadd.f32 %v3639_v52, %v1412_v51  ;;  %v4170_v55 = vpop.xlane.xlu0 %1429  ;;  %4914 = vst [vmem:[#allocation22_spill] sm:$0xff] %v4223_v41  ;;  %4915 = vst [vmem:[#allocation23_spill] sm:$0xff] %v4244_v46  ;;  %v4292_v41 = vadd.f32 %v3639_v52, %v3941_v58 }
 0x255   : > { %v4310_v58 = vadd.f32 %v3639_v52, %v3983_v37 }
 0x256   : > { %v2283_v11 = vrot.slane %v1591_v35, %v3981_v56 }
 0x257   : > { %v1415_v10 = vpop.xlane.xlu1 %1414 }
 0x258   : > { %v2284_v33 = vsel %vm1791_vm7, %v2283_v11, %v2279_v40  ;;  %v1592_v6 = vadd.f32 %v3639_v52, %v1415_v10  ;;  %v4175_v1 = vpop.xlane.xlu0 %1432 }
 0x25a   : > { %v2288_v50 = vrot.slane %v1592_v6, %v3988_v29  ;;  %v1821_v6 = vadd.s32 4294967208, %v3624_v38  ;;  %v4216_v29 = vadd.f32 %v3639_v52, %v3672_v26  ;;  %v4237_v26 = vadd.f32 %v3639_v52, %v3736_v59 }
 0x25b   : > { %v4178_v36 = vpop.xlane.xlu1 %1423  ;;  %v1807_v59 = vadd.s32 4294967224, %v3624_v38 }
 0x25c   : > { %v4181_v27 = vsel %vm1798_vm8, %v2288_v50, %v2284_v33  ;;  %v4183_v54 = vpop.xlane.xlu0 %1390  ;;  %v1814_v33 = vadd.s32 4294967216, %v3624_v38  ;;  %v1828_v50 = vadd.s32 4294967200, %v3624_v38  ;;  %4913 = vst [vmem:[#allocation21_spill] sm:$0xff] %v4216_v29  ;;  %v4219_v56 = vsub.s32 %v1821_v6, %v3243_v43 }
 0x25d   : > { %4910 = vst [vmem:[#allocation18_spill] sm:$0xff] %v4181_v27  ;;  %v1835_v27 = vadd.s32 4294967192, %v3624_v38  ;;  %v4240_v6 = vsub.s32 %v1842_v28, %v3243_v43  ;;  %v4259_v28 = vadd.f32 %v3639_v52, %v3859_v19  ;;  %v4296_v19 = vadd.f32 %v3639_v52, %v3951_v44 }
 0x25e   : > { %v4212_v45 = vsub.s32 %v1814_v33, %v3243_v43  ;;  %v4226_v5 = vsub.s32 %v1828_v50, %v3243_v43  ;;  %v4233_v33 = vadd.f32 %v3639_v52, %v3718_v63  ;;  %v4300_v29 = vadd.f32 %v3639_v52, %v3970_v49 }
 0x25f   : > { %v4185_v48 = vpop.xlane.xlu1 %1426  ;;  %4919 = vst [vmem:[#allocation27_spill] sm:$0xff] %v4296_v19  ;;  %v4314_v44 = vadd.f32 %v3639_v52, %v4000_v15  ;;  %v4331_v15 = vadd.f32 %v3639_v52, %v4034_v14  ;;  %v4335_v49 = vadd.f32 %v3639_v52, %v4040_v57  ;;  %v4348_v14 = vadd.f32 %v3639_v52, %v4046_v3 }
 0x260   : > { %v4187_v20 = vpop.xlane.xlu0 %1444  ;;  %4920 = vst [vmem:[#allocation28_spill] sm:$0xff] %v4300_v29  ;;  %v4365_v3 = vadd.f32 %v3639_v52, %v4056_v25  ;;  %v4369_v29 = vadd.f32 %v3639_v52, %v4058_v7 }
 0x261   : > { %v1602_v37 = vadd.f32 %v3639_v52, %v4187_v20 }
 0x263   : > { %v4189_v31 = vpop.xlane.xlu1 %1294 }
 0x264   : > { %v4191_v51 = vpop.xlane.xlu0 %1447 }
 0x267   : > { %v4193_v40 = vpop.xlane.xlu1 %1384 }
 0x268   : > { %v4195_v35 = vpop.xlane.xlu0 %1180 }
 0x26b   : > { %v4197_v11 = vpop.xlane.xlu1 %1387 }
 0x26c   : > { %4911 = vst [vmem:[#allocation19_spill] sm:$0xff] %v4197_v11  ;;  %v4199_v10 = vpop.xlane.xlu0 %1450  ;;  %v4247_v11 = vsub.s32 %v1849_v9, %v3243_v43  ;;  %v4284_v9 = vadd.f32 %v3639_v52, %v3927_v39  ;;  %v4322_v39 = vadd.f32 %v3639_v52, %v4020_v30  ;;  %v4358_v30 = vadd.f32 %v3639_v52, %v4052_v0 }
 0x26d   : > { %v4394_v0 = vadd.f32 %v3639_v52, %v4107_v23 }
 0x26e   : > { %4918 = vst [vmem:[#allocation26_spill] sm:$0xff] %v4284_v9 }
 0x26f   : > { %v4206_v16 = vpop.xlane.xlu1 %1435 }
 0x270   : > { %4912 = vst [vmem:[#allocation20_spill] sm:$0xff] %v4206_v16  ;;  %v4209_v8 = vpop.xlane.xlu0 %1453  ;;  %v4229_v16 = vsub.s32 %v1835_v27, %v3243_v43  ;;  %v4251_v27 = vadd.f32 %v3639_v52, %v3767_v62  ;;  %v4269_v62 = vadd.f32 %v3639_v52, %v3890_v21 }
 0x272   : > { %4916 = vst [vmem:[#allocation24_spill] sm:$0xff] %v4251_v27  ;;  %v1800_v27 = vadd.s32 4294967232, %v3624_v38  ;;  %v4373_v38 = vadd.f32 %v3639_v52, %v4060_v4  ;;  %v4390_v4 = vadd.f32 %v3639_v52, %v4102_v12  ;;  %v4410_v12 = vadd.f32 %v3639_v52, %v4134_v2 }
 0x273   : > { %v1442_v50 = vpop.xlane.xlu1 %1441  ;;  %v4427_v2 = vadd.f32 %v3639_v52, %v4157_v13  ;;  %v4442_v13 = vadd.f32 %v3639_v52, %v4170_v55  ;;  %v4457_v55 = vadd.f32 %v3639_v52, %v4178_v36 }
 0x274   : > { %v4253_v63 = vpop.xlane.xlu0 %1276  ;;  %v4384_v25 = vsub.s32 %v1800_v27, %v3243_v43  ;;  %v4406_v27 = vadd.f32 %v3639_v52, %v4123_v34  ;;  %v4423_v34 = vadd.f32 %v3639_v52, %v4147_v60  ;;  %v4461_v60 = vadd.f32 %v3639_v52, %v4183_v54 }
 0x275   : > { %4917 = vst [vmem:[#allocation25_spill] sm:$0xff] %v4253_v63  ;;  %v4273_v63 = vadd.f32 %v3639_v52, %v3908_v32  ;;  %v4325_v32 = vsub.s32 %v1807_v59, %v3243_v43  ;;  %v1601_v59 = vadd.f32 %v3639_v52, %v1442_v50  ;;  %v4398_v50 = vadd.f32 %v3639_v52, %v4114_v53 }
 0x276   : > { %v1603_v43 = vadd.f32 %v3639_v52, %v4191_v51  ;;  %4921 = vst [vmem:[#allocation29_spill] sm:$0xff] %v4427_v2  ;;  %4922 = vst [vmem:[#allocation30_spill] sm:$0xff] %v4442_v13  ;;  %v4453_v51 = vadd.f32 %v3639_v52, %v4175_v1  ;;  %v4485_v1 = vadd.f32 %v3639_v52, %v4193_v40 }
 0x277   : > { %v4286_v21 = vpop.xlane.xlu1 %1132  ;;  %v2333_v23 = vrot.slane %v1601_v59, %v3650_v61  ;;  %v4431_v61 = vadd.f32 %v3639_v52, %v4165_v42  ;;  %v2337_v59 = vrot.slane %v1602_v37, %v3654_v18  ;;  %v1604_v37 = vadd.f32 %v3639_v52, %v4199_v10  ;;  %4924 = vst [vmem:[#allocation32_spill] sm:$0xff] %v4461_v60 }
 0x278   : > { %v4302_v22 = vpop.xlane.xlu0 %1456  ;;  %4923 = vst [vmem:[#allocation31_spill] sm:$0xff] %v4453_v51  ;;  %v2342_v42 = vrot.slane %v1603_v43, %v3667_v17  ;;  %v4478_v17 = vadd.f32 %v3639_v52, %v4189_v31  ;;  %v1605_v43 = vadd.f32 %v3639_v52, %v4209_v8  ;;  %v1498_v40 = vadd.f32 %v3639_v52, %v4286_v21 }
 0x279   : > { %v2338_v19 = vsel %vm1756_vm2, %v2337_v59, %v2333_v23  ;;  %v4472_v23 = vadd.f32 %v3639_v52, %v4185_v48  ;;  %v4489_v48 = vadd.f32 %v3639_v52, %v4195_v35  ;;  %v2347_v54 = vrot.slane %v1604_v37, %v3695_v47  ;;  %v4926_v35 = vld [vmem:[#allocation19_spill] sm:$0xff]  ;;  %v4927_v37 = vld [vmem:[#allocation20_spill] sm:$0xff] }
 0x27a   : > { %4925 = vst [vmem:[#allocation33_spill] sm:$0xff] %v4478_v17  ;;  %v2343_v59 = vsel %vm1763_vm3, %v2342_v42, %v2338_v19  ;;  %v1606_v31 = vadd.f32 %v3639_v52, %v4302_v22  ;;  %v4506_v22 = vadd.f32 %v3639_v52, %v4926_v35  ;;  %v4510_v8 = vadd.f32 %v3639_v52, %v4927_v37 }
 0x27b   : > { %v4337_v46 = vpop.xlane.xlu1 %1228  ;;  %v2348_v19 = vsel %vm1770_vm4, %v2347_v54, %v2343_v59  ;;  %v1903_v54 = vrot.slane %v4489_v48, %v4325_v32  ;;  %v4931_v59 = vld [vmem:[#allocation9_spill] sm:$0xff]  ;;  %vm2411_vm2 = vcmask 1042434   ;;  %vm2413_vm3 = vcmask 1043459  }
 0x27c   : > { %v4350_v9 = vpop.xlane.xlu0 %1459  ;;  %4928 = vst [vmem:[#allocation19_spill] sm:$0xff] %v4510_v8  ;;  %v4930_v60 = vld [vmem:[#allocation25_spill] sm:$0xff]  ;;  %v2357_v2 = vrot.slane %v1606_v31, %v4931_v59  ;;  %vm2415_vm4 = vcmask 1044484  }
 0x27d   : > { %v1607_v42 = vadd.f32 %v3639_v52, %v4350_v9  ;;  %v4929_v9 = vld [vmem:[#allocation8_spill] sm:$0xff]  ;;  %v4518_v47 = vadd.f32 %v3639_v52, %v4930_v60  ;;  %v4932_v60 = vld [vmem:[#allocation10_spill] sm:$0xff] }
 0x27e   : > { %v2352_v51 = vrot.slane %v1605_v43, %v4929_v9 }
 0x27f   : > { %v4381_v57 = vpop.xlane.xlu1 %1324  ;;  %v2362_v9 = vrot.slane %v1607_v42, %v4932_v60 }
 0x280   : > { %v4400_v20 = vpop.xlane.xlu0 %1372  ;;  %v2353_v43 = vsel %vm1777_vm5, %v2352_v51, %v2348_v19  ;;  %v4534_v17 = vadd.f32 %v3639_v52, %v4381_v57  ;;  %v2061_v57 = vrot.slane %v4518_v47, %v4325_v32  ;;  %v4933_v19 = vld [vmem:[#allocation11_spill] sm:$0xff]  ;;  %vm2417_vm5 = vcmask 1045509  }
 0x281   : > { %v4542_v21 = vadd.f32 %v3639_v52, %v4400_v20  ;;  %v2358_v48 = vsel %vm1784_vm6, %v2357_v2, %v2353_v43  ;;  %v1811_v20 = vrot.slane %v1498_v40, %v4325_v32  ;;  %vm2419_vm6 = vcmask 1046534  }
 0x282   : > { %v2363_v8 = vsel %vm1791_vm7, %v2362_v9, %v2358_v48  ;;  %vm2421_vm7 = vcmask 1047559  }
 0x283   : > { %v1421_v53 = vpop.xlane.xlu1 %1420 }
 0x284   : > { %v1463_v7 = vpop.xlane.xlu0 %1462  ;;  %v4545_v51 = vadd.f32 %v3639_v52, %v1421_v53 }
 0x285   : > { %v1608_v35 = vadd.f32 %v3639_v52, %v1463_v7  ;;  %v1530_v7 = vadd.f32 %v3639_v52, %v4337_v46 }
 0x287   : > { %v1475_v36 = vpop.xlane.xlu1 %1474  ;;  %v2367_v42 = vrot.slane %v1608_v35, %v4933_v19  ;;  %v1982_v47 = vrot.slane %v1530_v7, %v4325_v32  ;;  %v4934_v7 = vld [vmem:[#allocation12_spill] sm:$0xff] }
 0x288   : > { %v1469_v10 = vpop.xlane.xlu0 %1468  ;;  %v4551_v59 = vadd.f32 %v3639_v52, %v1475_v36  ;;  %v2140_v36 = vrot.slane %v4534_v17, %v4325_v32 }
 0x289   : > { %v4557_v53 = vadd.f32 %v3639_v52, %v1469_v10  ;;  %v4574_v9 = vsel %vm1798_vm8, %v2367_v42, %v2363_v8 }
 0x28b   : > { %v1478_v18 = vpop.xlane.xlu1 %1477 }
 0x28c   : > { %v1472_v13 = vpop.xlane.xlu0 %1471  ;;  %v4588_v42 = vadd.f32 %v3639_v52, %v1478_v18 }
 0x28d   : > { %v4570_v10 = vadd.f32 %v3639_v52, %v1472_v13 }
 0x28f   : > { %v1130_v46 = vpop.xlane.xlu1 %1129  ;;  %v2382_v13 = vrot.slane %v4570_v10, %v4212_v45  ;;  %v4942_v10 = vrot.slane %v4233_v33, %v4226_v5 }
 0x290   : > { %v1178_v60 = vpop.xlane.xlu0 %1177  ;;  %v1497_v31 = vadd.f32 %v3639_v52, %v1130_v46 }
 0x291   : > { %v1513_v37 = vadd.f32 %v3639_v52, %v1178_v60  ;;  %v4935_v60 = vld [vmem:[#allocation14_spill] sm:$0xff] }
 0x292   : > { %v1804_v35 = vrot.slane %v1497_v31, %v4384_v25 }
 0x293   : > { %v1898_v40 = vrot.slane %v1513_v37, %v4384_v25  ;;  %v1226_v43 = vpop.xlane.xlu1 %1225 }
 0x294   : > { %v1806_v48 = vsel %vm1805_vm9, %v1804_v35, %v4934_v7  ;;  %v1274_v31 = vpop.xlane.xlu0 %1273  ;;  %v1529_v19 = vadd.f32 %v3639_v52, %v1226_v43  ;;  %v4936_v35 = vld [vmem:[#allocation21_spill] sm:$0xff] }
 0x295   : > { %v1899_v37 = vsel %vm1805_vm9, %v1898_v40, %v4935_v60  ;;  %v1813_v2 = vsel %vm1812_vm10, %v1811_v20, %v1806_v48  ;;  %v1545_v8 = vadd.f32 %v3639_v52, %v1274_v31  ;;  %v4937_v7 = vrot.slane %v4936_v35, %v4212_v45  ;;  %v4939_v48 = vld [vmem:[#allocation22_spill] sm:$0xff] }
 0x296   : > { %v1904_v17 = vsel %vm1812_vm10, %v1903_v54, %v1899_v37  ;;  %v1977_v46 = vrot.slane %v1529_v19, %v4384_v25  ;;  %v4938_v20 = vrot.slane %v4259_v28, %v4212_v45  ;;  %v4940_v18 = vrot.slane %v4939_v48, %v4219_v56  ;;  %v4943_v37 = vld [vmem:[#allocation13_spill] sm:$0xff] }
 0x297   : > { %v1820_v43 = vsel %vm1819_vm11, %v4937_v7, %v1813_v2  ;;  %v2056_v31 = vrot.slane %v1545_v8, %v4384_v25  ;;  %v1322_v60 = vpop.xlane.xlu1 %1321  ;;  %v4941_v2 = vrot.slane %v4263_v24, %v4219_v56  ;;  %v4944_v8 = vrot.slane %v4269_v62, %v4226_v5 }
 0x298   : > { %v1909_v40 = vsel %vm1819_vm11, %v4938_v20, %v1904_v17  ;;  %v1827_v54 = vsel %vm1826_vm12, %v4940_v18, %v1820_v43  ;;  %v1978_v17 = vsel %vm1805_vm9, %v1977_v46, %v4943_v37  ;;  %v1370_v35 = vpop.xlane.xlu0 %1369  ;;  %v1561_v7 = vadd.f32 %v3639_v52, %v1322_v60 }
 0x299   : > { %v1914_v19 = vsel %vm1826_vm12, %v4941_v2, %v1909_v40  ;;  %v1834_v28 = vsel %vm1833_vm13, %v4942_v10, %v1827_v54  ;;  %v4945_v24 = vrot.slane %v4237_v26, %v4229_v16  ;;  %v4946_v40 = vld [vmem:[#allocation16_spill] sm:$0xff]  ;;  %v1983_v48 = vsel %vm1812_vm10, %v1982_v47, %v1978_v17  ;;  %v4948_v54 = vld [vmem:[#allocation23_spill] sm:$0xff] }
 0x29a   : > { %v1919_v43 = vsel %vm1833_vm13, %v4944_v8, %v1914_v19  ;;  %v2057_v33 = vsel %vm1805_vm9, %v2056_v31, %v4946_v40  ;;  %v4947_v46 = vrot.slane %v4273_v63, %v4229_v16  ;;  %v4949_v62 = vrot.slane %v4948_v54, %v4240_v6  ;;  %v4951_v31 = vld [vmem:[#allocation26_spill] sm:$0xff] }
 0x29b   : > { %v1841_v20 = vsel %vm1840_vm14, %v4945_v24, %v1834_v28  ;;  %v2062_v2 = vsel %vm1812_vm10, %v2061_v57, %v2057_v33  ;;  %v4950_v26 = vrot.slane %v4310_v58, %v4212_v45  ;;  %v4952_v47 = vrot.slane %v4951_v31, %v4240_v6  ;;  %v1418_v58 = vpop.xlane.xlu1 %1417 }
 0x29c   : > { %v1924_v18 = vsel %vm1840_vm14, %v4947_v46, %v1919_v43  ;;  %v1848_v60 = vsel %vm1847_vm15, %v4949_v62, %v1841_v20  ;;  %v4953_v63 = vrot.slane %v4390_v4, %v4212_v45  ;;  %v4954_v37 = vrot.slane %v4314_v44, %v4219_v56  ;;  %v1466_v40 = vpop.xlane.xlu0 %1465  ;;  %v4961_v62 = vld [vmem:[#allocation15_spill] sm:$0xff] }
 0x29d   : > { %v1988_v19 = vsel %vm1819_vm11, %v4950_v26, %v1983_v48  ;;  %v1929_v10 = vsel %vm1847_vm15, %v4952_v47, %v1924_v18  ;;  %v1577_v17 = vadd.f32 %v3639_v52, %v1370_v35  ;;  %v4955_v8 = vrot.slane %v4394_v0, %v4219_v56  ;;  %v4962_v26 = vld [vmem:[#allocation17_spill] sm:$0xff]  ;;  %v4963_v47 = vld [vmem:[#allocation24_spill] sm:$0xff] }
 0x29e   : > { %v2067_v28 = vsel %vm1819_vm11, %v4953_v63, %v2062_v2  ;;  %v1993_v57 = vsel %vm1826_vm12, %v4954_v37, %v1988_v19  ;;  %v4956_v24 = vrot.slane %v4322_v39, %v4226_v5  ;;  %v2135_v20 = vrot.slane %v1561_v7, %v4384_v25 }
 0x29f   : > { %v2072_v43 = vsel %vm1826_vm12, %v4955_v8, %v2067_v28  ;;  %v1593_v44 = vadd.f32 %v3639_v52, %v1418_v58  ;;  %v4957_v35 = vrot.slane %v4398_v50, %v4226_v5  ;;  %v4958_v0 = vrot.slane %v4335_v49, %v4229_v16  ;;  %v4967_v58 = vld [vmem:[#allocation18_spill] sm:$0xff] }
 0x2a0   : > { %v1998_v4 = vsel %vm1833_vm13, %v4956_v24, %v1993_v57  ;;  %v2214_v39 = vrot.slane %v1577_v17, %v4384_v25  ;;  %v1609_v46 = vadd.f32 %v3639_v52, %v1466_v40  ;;  %v4959_v7 = vrot.slane %v4410_v12, %v4229_v16 }
 0x2a1   : > { %v2077_v33 = vsel %vm1833_vm13, %v4957_v35, %v2072_v43  ;;  %v2003_v48 = vsel %vm1840_vm14, %v4958_v0, %v1998_v4  ;;  %v4960_v50 = vrot.slane %v4358_v30, %v4240_v6  ;;  %v2136_v49 = vsel %vm1805_vm9, %v2135_v20, %v4961_v62  ;;  %v1439_v43 = vpop.xlane.xlu1 %1438  ;;  %v4983_v62 = vld [vmem:[#allocation33_spill] sm:$0xff] }
 0x2a2   : > { %v2082_v18 = vsel %vm1840_vm14, %v4959_v7, %v2077_v33  ;;  %v2293_v2 = vrot.slane %v1593_v44, %v4384_v25  ;;  %v2215_v19 = vsel %vm1805_vm9, %v2214_v39, %v4962_v26  ;;  %v2141_v31 = vsel %vm1812_vm10, %v2140_v36, %v2136_v49 }
 0x2a3   : > { %v2008_v54 = vsel %vm1847_vm15, %v4960_v50, %v2003_v48  ;;  %v2372_v12 = vrot.slane %v1609_v46, %v4384_v25  ;;  %v4964_v63 = vrot.slane %v4963_v47, %v4247_v11  ;;  %v4965_v28 = vrot.slane %v4542_v21, %v4325_v32  ;;  %v1481_v25 = vpop.xlane.xlu0 %1480 }
 0x2a4   : > { %v4966_v57 = vrot.slane %v4331_v15, %v4212_v45  ;;  %v2294_v36 = vsel %vm1805_vm9, %v2293_v2, %v4967_v58  ;;  %v4968_v8 = vrot.slane %v4292_v41, %v4247_v11  ;;  %v4969_v21 = vrot.slane %v4406_v27, %v4212_v45  ;;  %v4985_v2 = vld [vmem:[#allocation27_spill] sm:$0xff] }
 0x2a5   : > { %v1855_v30 = vsel %vm1854_vm0, %v4964_v63, %v1848_v60  ;;  %v2220_v37 = vsel %vm1812_vm10, %v4965_v28, %v2215_v19  ;;  %v4970_v15 = vrot.slane %v4348_v14, %v4219_v56  ;;  %v2373_v20 = vsel %vm1805_vm9, %v2372_v12, %v4574_v9  ;;  %v4991_v28 = vld [vmem:[#allocation30_spill] sm:$0xff] }
 0x2a6   : > { %v2146_v17 = vsel %vm1819_vm11, %v4966_v57, %v2141_v31  ;;  %v1934_v60 = vsel %vm1854_vm0, %v4968_v8, %v1929_v10  ;;  %v2225_v24 = vsel %vm1819_vm11, %v4969_v21, %v2220_v37  ;;  %v4971_v41 = vrot.slane %v4545_v51, %v4325_v32  ;;  %v1487_v57 = vpop.xlane.xlu1 %1486 }
 0x2a7   : > { %v2151_v4 = vsel %vm1826_vm12, %v4970_v15, %v2146_v17  ;;  %v4972_v40 = vrot.slane %v4423_v34, %v4219_v56  ;;  %v4973_v44 = vrot.slane %v4365_v3, %v4226_v5  ;;  %v4974_v35 = vrot.slane %v4557_v53, %v4325_v32  ;;  %v1484_v19 = vpop.xlane.xlu0 %1483  ;;  %v4993_v17 = vld [vmem:[#allocation32_spill] sm:$0xff] }
 0x2a8   : > { %v2299_v10 = vsel %vm1812_vm10, %v4971_v41, %v2294_v36  ;;  %v4975_v51 = vrot.slane %v4457_v55, %v4212_v45  ;;  %v4976_v34 = vrot.slane %v4431_v61, %v4226_v5  ;;  %v4977_v3 = vrot.slane %v4373_v38, %v4229_v16  ;;  %v4980_v38 = vld [vmem:[#allocation29_spill] sm:$0xff] }
 0x2a9   : > { %v2230_v27 = vsel %vm1826_vm12, %v4972_v40, %v2225_v24  ;;  %v2156_v14 = vsel %vm1833_vm13, %v4973_v44, %v2151_v4  ;;  %v2378_v9 = vsel %vm1812_vm10, %v4974_v35, %v2373_v20  ;;  %v4978_v32 = vrot.slane %v4472_v23, %v4219_v56 }
 0x2aa   : > { %v2304_v33 = vsel %vm1819_vm11, %v4975_v51, %v2299_v10  ;;  %v2235_v0 = vsel %vm1833_vm13, %v4976_v34, %v2230_v27  ;;  %v2161_v48 = vsel %vm1840_vm14, %v4977_v3, %v2156_v14  ;;  %v2383_v39 = vsel %vm1819_vm11, %v2382_v13, %v2378_v9 }
 0x2ab   : > { %v2309_v53 = vsel %vm1826_vm12, %v4978_v32, %v2304_v33  ;;  %v2392_v45 = vrot.slane %v4588_v42, %v4226_v5  ;;  %v1614_v55 = vadd.f32 %v3639_v52, %v1481_v25  ;;  %v4979_v61 = vrot.slane %v4369_v29, %v4247_v11  ;;  %v4995_v25 = vld [vmem:[#allocation31_spill] sm:$0xff] }
 0x2ac   : > { %v4981_v7 = vrot.slane %v4980_v38, %v4240_v6  ;;  %v4982_v23 = vrot.slane %v4551_v59, %v4219_v56  ;;  %v4984_v42 = vrot.slane %v4983_v62, %v4247_v11  ;;  %v4986_v29 = vrot.slane %v4985_v2, %v4240_v6  ;;  %v4988_v59 = vld [vmem:[#allocation28_spill] sm:$0xff]  ;;  %v4999_v33 = vld [vmem:[#allocation7_spill] sm:$0xff] }
 0x2ad   : > { %v2013_v46 = vsel %vm1854_vm0, %v4979_v61, %v2008_v54  ;;  %v4987_v26 = vrot.slane %v4485_v1, %v4229_v16  ;;  %v2397_v56 = vrot.slane %v1614_v55, %v4229_v16  ;;  %v4989_v31 = vrot.slane %v4988_v59, %v4247_v11 }
 0x2ae   : > { %v2087_v13 = vsel %vm1847_vm15, %v4981_v7, %v2082_v18  ;;  %v2388_v50 = vsel %vm1826_vm12, %v4982_v23, %v2383_v39  ;;  %v2166_v54 = vsel %vm1847_vm15, %v4986_v29, %v2161_v48  ;;  %v4990_v47 = vrot.slane %v4506_v22, %v4240_v6 }
 0x2af   : > { %v2092_v49 = vsel %vm1854_vm0, %v4984_v42, %v2087_v13  ;;  %v2240_v18 = vsel %vm1840_vm14, %v4987_v26, %v2235_v0  ;;  %v2171_v12 = vsel %vm1854_vm0, %v4989_v31, %v2166_v54  ;;  %v4992_v37 = vrot.slane %v4991_v28, %v4226_v5  ;;  %v4997_v5 = vld [vmem:[#allocation19_spill] sm:$0xff] }
 0x2b0   : > { %v2245_v63 = vsel %vm1847_vm15, %v4990_v47, %v2240_v18  ;;  %v4994_v58 = vrot.slane %v4993_v17, %v4247_v11  ;;  %v4996_v8 = vrot.slane %v4995_v25, %v4229_v16  ;;  %v2410_v22 = vsel %vm2409_vm1, %v1934_v60, %v1855_v30 }
 0x2b1   : > { %v2314_v1 = vsel %vm1833_vm13, %v4992_v37, %v2309_v53  ;;  %v1600_v24 = vadd.f32 %v3639_v52, %v1439_v43  ;;  %v2393_v15 = vsel %vm1833_vm13, %v2392_v45, %v2388_v50  ;;  %v4998_v4 = vrot.slane %v4997_v5, %v4240_v6 }
 0x2b2   : > { %v2250_v36 = vsel %vm1854_vm0, %v4994_v58, %v2245_v63  ;;  %v2319_v21 = vsel %vm1840_vm14, %v4996_v8, %v2314_v1  ;;  %v2412_v41 = vsel %vm2411_vm2, %v2013_v46, %v2410_v22  ;;  %v1615_v10 = vadd.f32 %v3639_v52, %v1484_v19 }
 0x2b3   : > { %v2324_v20 = vsel %vm1847_vm15, %v4998_v4, %v2319_v21  ;;  %v2414_v40 = vsel %vm2413_vm3, %v2092_v49, %v2412_v41  ;;  %v2328_v16 = vrot.slane %v1600_v24, %v4247_v11  ;;  %v1616_v30 = vadd.f32 %v3639_v52, %v1487_v57 }
 0x2b4   : > { %v2416_v60 = vsel %vm2415_vm4, %v2171_v12, %v2414_v40  ;;  %v2402_v43 = vrot.slane %v1615_v10, %v4240_v6  ;;  %v2398_v27 = vsel %vm1840_vm14, %v2397_v56, %v2393_v15  ;;  %vm2426_vm8 = vcmp.lt.s32.totalorder %v4999_v33, 8 }
 0x2b5   : > { %v2418_v44 = vsel %vm2417_vm5, %v2250_v36, %v2416_v60  ;;  %v2329_v14 = vsel %vm1854_vm0, %v2328_v16, %v2324_v20  ;;  %v2407_v35 = vrot.slane %v1616_v30, %v4247_v11 }
 0x2b6   : > { %v2420_v9 = vsel %vm2419_vm6, %v2329_v14, %v2418_v44  ;;  %v2403_v51 = vsel %vm1847_vm15, %v2402_v43, %v2398_v27 }
 0x2b7   : > { %v2408_v52 = vsel %vm1854_vm0, %v2407_v35, %v2403_v51 }
 0x2b8   : > { %v2422_v34 = vsel %vm2421_vm7, %v2408_v52, %v2420_v9 }
 0x2b9   : > { %v2427_v6 = vsel %vm2426_vm8, %v2422_v34, -1e+30 }
 0x2ba   : > { %2428 = vmax.xlane.f32.xlu0 %v2427_v6 }
 0x347   : > { %v2429_v0 = vpop.xlane.xlu0 %2428 }
 0x348   : > { %v2430_v3 = vsub.f32 %v2427_v6, %v2429_v0 }
 0x34a   : > { %v2431_v48 = vmul.f32 1.442695, %v2430_v3 }
 0x34c   : > { %2969 = vpow2.f32 %v2431_v48 }
 0x356   : > { %v2970_v39 = vpop.eup %2969 }
 0x357   : > { %2433 = vadd.xlane.f32.xlu1 %v2970_v39 }
 0x3e4   : > { %v2434_v11 = vpop.xlane.xlu1 %2433 }
 0x3e5   : > { %2971 = vrcp.f32 %v2434_v11 }
 0x3ef   : > { %v2972_v32 = vpop.eup %2971 }
 0x3f0   : > { %v2436_v53 = vmul.f32 %v2972_v32, %v2970_v39 }
 0x3f2   : > { %2437 = vst [vmem:[%s280_s15] sm:$0xff] %v2436_v53 }
 0x3f3   : > { %3000 = shalt.err (!%p2997_p5)
}
 0x3f4   : > { %s3001_s29 = scalar_lea.hbm %s4825_s19, 128  ;;  %s3005_s12 = scalar_lea.hbm %s4878_s6, 256 }
 0x3f5   : > { %p3002_p6 = scmp.ne.s32.totalorder %s4825_s19, %s3001_s29  ;;  %p3006_p10 = scmp.lt.u32.totalorder %s4825_s19, %s4878_s6 }
 0x3f6   : > { %p3007_p11 = scmp.lt.u32.totalorder %s3005_s12, %s3001_s29  ;;  %p3009_p13 = scmp.lt.u32.totalorder %s3001_s29, %s4825_s19 }
 0x3f7   : > { %p3003_p7 = pnand %p3002_p6, %p3150_p4 }
 0x3f8   : > { %p3008_p12 = por %p3007_p11, %p3006_p10 }
 0x3f9   : > { %p3004_p9 = pneg %p3003_p7 }
 0x3fa   : > { %p3010_p0 = por %p3009_p13, %p3008_p12 }
 0x3fc   : > { %p3011_p1 = pnand %p3010_p0, %p3004_p9 }
 0x3fe   : > { %3014 = shalt.err (!%p3011_p1)
}
 0x3ff   : > { %2654 = dma.vmem_to_hbm [thread:$0]  (%p3150_p4), %s4827_s16, 128, %s4825_s19, %s2439_s21  }
 0x400 PF: > { %p2660_p2 = scmp.ge.s32.totalorder %s3065_s28, 2  ;;  %s2465_s15 = sand.u32 1, %s3045_s23  }
 0x401   : > { %s2466_s17 = scalar_lea.sflag [#allocation5], %s2465_s15 }
 0x402   : > { %p2657_p3 = pnand %p2660_p2, %p3157_p8 }
 0x404   : > { %3040 = dma.done.wait (!%p2657_p3), %s2466_s17, 128  }
 0x405   : > { %3042 = vsyncadd (!%p2657_p3), %s2466_s17, 4294967168  ;;  %s20_s28 = sadd.s32 1, %s3065_s28   ;;  %s5000_s23 = smov %s3049_s24 }
 0x406   : > { %p17_p5 = scmp.ge.s32.totalorder %s20_s28, 4   ;;  %s5001_s24 = smov %s3053_s25 }
 0x407   : > { %s5002_s25 = smov %s3163_s11  ;;  %s5003_s26 = smov %s3061_s27 }
 0x408   : > { %s5004_s27 = smov %s5006_s30  ;;  %19 = sbr.rel (!%p17_p5) target bundleno = 6 (0x6), region = 86 }
 0x40f   :  { %2471 = vsyncpa [#allocation5], 1 }
 0x410   :  { %2473 = vsyncpa [#allocation5 + $0x1], 1 }

</bundles_post_ra>
